<compile_context>
chip_gen: v7x
topology: tpu7x:2x2x1
jax: 0.10.0
libtpu: 0.0.40
codegen_flags: <defaults>
</compile_context>

<pallas_src>
import functools
import math

import jax
import jax.numpy as jnp
import numpy as np
from jax.experimental import pallas as pl
from jax.experimental.pallas import tpu as pltpu

COMPUTE_DTYPE = jnp.bfloat16            # MXU-native operand dtype on v5e/v6e/v7x
VMEM_LIMIT_BYTES = 64 * 1024 * 1024     # explicit scoped-VMEM budget (>= v5e/v6e defaults)


# ----------------------------------------------------------------------------
# Shared encoder AttentionBlock body:
#   GroupNorm (affine pre-folded) -> QKV -> flash-style MHSA -> out-proj -> +residual
# ----------------------------------------------------------------------------
def _attention_block_body(h0, member, member_t, wqkv, bqkv, wproj, bproj,
                          *, n_heads, eps, kv_tile):
    """h0: (T, C) f32. Weights bf16, biases/masks f32. Returns (T, C) f32."""
    T, C = h0.shape
    G = member.shape[1]
    cdt = wqkv.dtype
    n = jnp.float32(T * (C // G))

    # GroupNorm statistics (two-pass, numerically stable).  gamma/beta already folded into wqkv.
    s1 = jnp.sum(h0, axis=0, keepdims=True)                                  # (1, C)
    mean_g = jnp.dot(s1, member, preferred_element_type=jnp.float32) / n     # (1, G)
    mean_c = jnp.dot(mean_g, member_t, preferred_element_type=jnp.float32)   # (1, C)
    d = h0 - mean_c
    s2 = jnp.sum(d * d, axis=0, keepdims=True)                               # (1, C)
    var_g = jnp.dot(s2, member, preferred_element_type=jnp.float32) / n      # (1, G)
    inv_c = jnp.dot(jax.lax.rsqrt(var_g + eps), member_t,
                    preferred_element_type=jnp.float32)                      # (1, C)
    xn = (d * inv_c).astype(cdt)                                             # (T, C) bf16

    # QKV projection; columns pre-permuted to [Q_all | K_all | V_all] (head-major).
    qkv = jnp.dot(xn, wqkv, preferred_element_type=jnp.float32) + bqkv       # (T, 3C) f32
    q_all = qkv[:, :C].astype(cdt)
    k_all = qkv[:, C:2 * C].astype(cdt)
    v_all = qkv[:, 2 * C:].astype(cdt)

    ch = C // n_heads
    scale = 1.0 / math.sqrt(ch)
    tk = min(kv_tile, T)
    n_chunks = (T + tk - 1) // tk                      # static

    out = jnp.zeros((T, C), jnp.float32)
    for h in range(n_heads):                           # static unrolled (n_heads small)
        qh = q_all[:, h * ch:(h + 1) * ch]
        m_i = jnp.full((T, 1), -jnp.inf, jnp.float32)
        l_i = jnp.zeros((T, 1), jnp.float32)
        o_i = jnp.zeros((T, ch), jnp.float32)
        for c in range(n_chunks):                      # flash-style KV tiling (online softmax)
            lo = c * tk
            hi = min(lo + tk, T)
            kh = k_all[lo:hi, h * ch:(h + 1) * ch]
            vh = v_all[lo:hi, h * ch:(h + 1) * ch]
            s = jax.lax.dot_general(qh, kh, (((1,), (1,)), ((), ())),
                                    preferred_element_type=jnp.float32) * scale  # (T, tk)
            m_new = jnp.maximum(m_i, jnp.max(s, axis=-1, keepdims=True))
            alpha = jnp.exp(m_i - m_new)
            p = jnp.exp(s - m_new)
            l_i = alpha * l_i + jnp.sum(p, axis=-1, keepdims=True)
            o_i = alpha * o_i + jnp.dot(p.astype(cdt), vh,
                                        preferred_element_type=jnp.float32)
            m_i = m_new
        o_i = o_i * pl.reciprocal(l_i, approx=True)
        # Fold head output straight into the output projection (no concat / packing stores).
        out = out + jnp.dot(o_i.astype(cdt), wproj[h * ch:(h + 1) * ch, :],
                            preferred_element_type=jnp.float32)

    return h0 + out + bproj


def _enc_block_kernel(x_ref, mem_ref, memt_ref, wqkv_ref, bqkv_ref,
                      wproj_ref, bproj_ref, o_ref, *, n_heads, eps, kv_tile):
    h0 = x_ref[0].astype(jnp.float32)                                        # (T, C)
    out = _attention_block_body(h0, mem_ref[...], memt_ref[...],
                                wqkv_ref[...], bqkv_ref[...],
                                wproj_ref[...], bproj_ref[...],
                                n_heads=n_heads, eps=eps, kv_tile=kv_tile)
    o_ref[0] = out.astype(o_ref.dtype)


def _enc_first_block_kernel(x_ref, wi_ref, bi_ref, mem_ref, memt_ref,
                            wqkv_ref, bqkv_ref, wproj_ref, bproj_ref, o_ref,
                            *, n_heads, eps, kv_tile):
    # Entry 1x1 conv fused into the first block: x block is (T, Cin) channels-last.
    xr = x_ref[0].astype(wi_ref.dtype)                                       # (T, Cin) bf16
    h0 = jnp.dot(xr, wi_ref[...], preferred_element_type=jnp.float32) + bi_ref[...]
    out = _attention_block_body(h0, mem_ref[...], memt_ref[...],
                                wqkv_ref[...], bqkv_ref[...],
                                wproj_ref[...], bproj_ref[...],
                                n_heads=n_heads, eps=eps, kv_tile=kv_tile)
    o_ref[0] = out.astype(o_ref.dtype)


def _common_cp():
    return pltpu.CompilerParams(dimension_semantics=("parallel",),
                                vmem_limit_bytes=VMEM_LIMIT_BYTES)


def encoder_first_block(x_t, enc, blk, *, n_heads, eps=1e-5, kv_tile=512):
    B, T, Cin = x_t.shape
    C = blk["qkv_w"].shape[0]
    G = enc["member"].shape[1]
    kern = functools.partial(_enc_first_block_kernel, n_heads=n_heads, eps=eps, kv_tile=kv_tile)
    return pl.pallas_call(
        kern,
        out_shape=jax.ShapeDtypeStruct((B, T, C), jnp.float32),
        grid=(B,),
        in_specs=[
            pl.BlockSpec((1, T, Cin), lambda i: (i, 0, 0)),
            pl.BlockSpec((Cin, C), lambda i: (0, 0)),
            pl.BlockSpec((1, C), lambda i: (0, 0)),
            pl.BlockSpec((C, G), lambda i: (0, 0)),
            pl.BlockSpec((G, C), lambda i: (0, 0)),
            pl.BlockSpec((C, 3 * C), lambda i: (0, 0)),
            pl.BlockSpec((1, 3 * C), lambda i: (0, 0)),
            pl.BlockSpec((C, C), lambda i: (0, 0)),
            pl.BlockSpec((1, C), lambda i: (0, 0)),
        ],
        out_specs=pl.BlockSpec((1, T, C), lambda i: (i, 0, 0)),
        compiler_params=_common_cp(),
    )(x_t, enc["init_w"], enc["init_b"], enc["member"], enc["member_t"],
      blk["qkv_w"], blk["qkv_b"], blk["proj_w"], blk["proj_b"])


def encoder_block(h, enc, blk, *, n_heads, eps=1e-5, kv_tile=512):
    B, T, C = h.shape
    G = enc["member"].shape[1]
    kern = functools.partial(_enc_block_kernel, n_heads=n_heads, eps=eps, kv_tile=kv_tile)
    return pl.pallas_call(
        kern,
        out_shape=jax.ShapeDtypeStruct((B, T, C), jnp.float32),
        grid=(B,),
        in_specs=[
            pl.BlockSpec((1, T, C), lambda i: (i, 0, 0)),
            pl.BlockSpec((C, G), lambda i: (0, 0)),
            pl.BlockSpec((G, C), lambda i: (0, 0)),
            pl.BlockSpec((C, 3 * C), lambda i: (0, 0)),
            pl.BlockSpec((1, 3 * C), lambda i: (0, 0)),
            pl.BlockSpec((C, C), lambda i: (0, 0)),
            pl.BlockSpec((1, C), lambda i: (0, 0)),
        ],
        out_specs=pl.BlockSpec((1, T, C), lambda i: (i, 0, 0)),
        compiler_params=_common_cp(),
    )(h, enc["member"], enc["member_t"],
      blk["qkv_w"], blk["qkv_b"], blk["proj_w"], blk["proj_b"])


# ----------------------------------------------------------------------------
# Fused PerceiverResampler layer:
#   cross-attn(latents -> [latents; ctx]) + residual, GELU MLP + residual,
#   optional fused final RMSNorm.  The [latents; ctx] concat is never materialized:
#   kv is computed separately for latents and context and softmax-combined.
# ----------------------------------------------------------------------------
def _resampler_layer_kernel(lat_ref, ctx_ref, wq_ref, wkv_ref, wo_ref,
                            w1_ref, b1_ref, w2_ref, b2_ref, g_ref, o_ref,
                            *, heads, dim_head, apply_final_norm, norm_eps):
    cdt = wq_ref.dtype
    lat = lat_ref[0].astype(jnp.float32)                                    # (L, D)
    lat_c = lat.astype(cdt)
    ctx_c = ctx_ref[0].astype(cdt)                                          # (T, D)
    inner = heads * dim_head
    D = lat.shape[-1]

    q = jnp.dot(lat_c, wq_ref[...], preferred_element_type=jnp.float32)      # (L, inner)
    kv_lat = jnp.dot(lat_c, wkv_ref[...], preferred_element_type=jnp.float32)  # (L, 2*inner)
    kv_ctx = jnp.dot(ctx_c, wkv_ref[...], preferred_element_type=jnp.float32)  # (T, 2*inner)
    wo = wo_ref[...]                                                          # (inner, D)

    scale = dim_head ** -0.5
    attn = jnp.zeros(lat.shape, jnp.float32)                                  # (L, D)
    for h in range(heads):                                                    # static unrolled
        ks = slice(h * dim_head, (h + 1) * dim_head)
        vs = slice(inner + h * dim_head, inner + (h + 1) * dim_head)
        qh = q[:, ks].astype(cdt)
        kl, vl = kv_lat[:, ks].astype(cdt), kv_lat[:, vs].astype(cdt)
        kc, vc = kv_ctx[:, ks].astype(cdt), kv_ctx[:, vs].astype(cdt)
        s_l = jax.lax.dot_general(qh, kl, (((1,), (1,)), ((), ())),
                                  preferred_element_type=jnp.float32) * scale  # (L, L)
        s_c = jax.lax.dot_general(qh, kc, (((1,), (1,)), ((), ())),
                                  preferred_element_type=jnp.float32) * scale  # (L, T)
        m = jnp.maximum(jnp.max(s_l, axis=-1, keepdims=True),
                        jnp.max(s_c, axis=-1, keepdims=True))
        p_l = jnp.exp(s_l - m)
        p_c = jnp.exp(s_c - m)
        denom = jnp.sum(p_l, axis=-1, keepdims=True) + jnp.sum(p_c, axis=-1, keepdims=True)
        o = (jnp.dot(p_l.astype(cdt), vl, preferred_element_type=jnp.float32) +
             jnp.dot(p_c.astype(cdt), vc, preferred_element_type=jnp.float32))  # (L, dim_head)
        o = o * pl.reciprocal(denom, approx=True)
        attn = attn + jnp.dot(o.astype(cdt), wo[h * dim_head:(h + 1) * dim_head, :],
                              preferred_element_type=jnp.float32)

    lat1 = lat + attn                                                         # residual 1

    # Feed-forward (tanh-approx GELU) + residual 2
    h1 = jnp.dot(lat1.astype(cdt), w1_ref[...], preferred_element_type=jnp.float32) + b1_ref[...]
    h1 = jax.nn.gelu(h1, approximate=True)
    out = lat1 + jnp.dot(h1.astype(cdt), w2_ref[...], preferred_element_type=jnp.float32) + b2_ref[...]

    if apply_final_norm:
        # RMSNorm: F.normalize(x, dim=-1) * sqrt(D) * gamma  (fused into last layer)
        norm = jnp.sqrt(jnp.sum(out * out, axis=-1, keepdims=True))
        out = out / jnp.maximum(norm, norm_eps)
        out = out * math.sqrt(D) * g_ref[...]

    o_ref[0] = out.astype(o_ref.dtype)


def resampler_layer(lat, ctx, p, norm_g, *, heads, dim_head, apply_final_norm,
                    norm_eps=1e-12):
    B, L, D = lat.shape
    T = ctx.shape[1]
    inner = heads * dim_head
    Hf = p["ff_w1"].shape[1]
    kern = functools.partial(_resampler_layer_kernel, heads=heads, dim_head=dim_head,
                             apply_final_norm=apply_final_norm, norm_eps=norm_eps)
    return pl.pallas_call(
        kern,
        out_shape=jax.ShapeDtypeStruct((B, L, D), jnp.float32),
        grid=(B,),
        in_specs=[
            pl.BlockSpec((1, L, D), lambda i: (i, 0, 0)),
            pl.BlockSpec((1, T, D), lambda i: (i, 0, 0)),
            pl.BlockSpec((D, inner), lambda i: (0, 0)),
            pl.BlockSpec((D, 2 * inner), lambda i: (0, 0)),
            pl.BlockSpec((inner, D), lambda i: (0, 0)),
            pl.BlockSpec((D, Hf), lambda i: (0, 0)),
            pl.BlockSpec((1, Hf), lambda i: (0, 0)),
            pl.BlockSpec((Hf, D), lambda i: (0, 0)),
            pl.BlockSpec((1, D), lambda i: (0, 0)),
            pl.BlockSpec((1, D), lambda i: (0, 0)),
        ],
        out_specs=pl.BlockSpec((1, L, D), lambda i: (i, 0, 0)),
        compiler_params=_common_cp(),
    )(lat, ctx, p["wq"], p["wkv"], p["wo"],
      p["ff_w1"], p["ff_b1"], p["ff_w2"], p["ff_b2"], norm_g)


# ----------------------------------------------------------------------------
# Module forward (glue only: one tiny NCW->NTC transpose + broadcast of latents)
# ----------------------------------------------------------------------------
def perceiver_conditioner(x, prepared, *, enc_heads=4, res_heads=8, res_dim_head=64,
                          kv_tile=512):
    B, Cin, T = x.shape
    enc = prepared["enc"]

    # --- ConditioningEncoder (channels-last internally; entry 1x1 conv fused into block 0) ---
    x_t = jnp.transpose(x, (0, 2, 1))                       # (B, T, Cin), Cin << C so cheap
    h = encoder_first_block(x_t, enc, enc["blocks"][0], n_heads=enc_heads, kv_tile=kv_tile)
    for blk in enc["blocks"][1:]:
        h = encoder_block(h, enc, blk, n_heads=enc_heads, kv_tile=kv_tile)
    # PyTorch does x.transpose(-1,-2) on (B, D, T) -> (B, T, D); h is already (B, T, D).

    # --- PerceiverResampler (final RMSNorm fused into the last layer) ---
    lat = jnp.broadcast_to(prepared["latents"][None], (B,) + prepared["latents"].shape)
    n_layers = len(prepared["res_layers"])
    for li, layer in enumerate(prepared["res_layers"]):
        lat = resampler_layer(lat, h, layer, prepared["res_norm_g"],
                              heads=res_heads, dim_head=res_dim_head,
                              apply_final_norm=(li == n_layers - 1))
    return lat                                              # (B, num_latents, D)


# ----------------------------------------------------------------------------
# Parameter initialization (synthetic, PyTorch-equivalent layout) + kernel-ready preparation
# ----------------------------------------------------------------------------
def init_params(key, in_dim, model_dim, num_latents, *,
                enc_blocks=6, res_depth=2, res_heads=8, res_dim_head=64,
                ff_mult=4, dtype=jnp.float32):
    def nrm(k, shape, scale=0.02):
        return (scale * jax.random.normal(k, shape)).astype(dtype)

    keys = iter(jax.random.split(key, 256))
    p = {}
    p["enc_init_w"] = nrm(next(keys), (in_dim, model_dim), 0.2)
    p["enc_init_b"] = jnp.zeros((model_dim,), dtype)
    p["enc_blocks"] = []
    for _ in range(enc_blocks):
        p["enc_blocks"].append(dict(
            gn_g=jnp.ones((model_dim,), dtype),
            gn_b=jnp.zeros((model_dim,), dtype),
            qkv_w=nrm(next(keys), (model_dim, 3 * model_dim)),   # per-head interleaved [q|k|v]
            qkv_b=jnp.zeros((3 * model_dim,), dtype),
            proj_w=nrm(next(keys), (model_dim, model_dim)),      # original zero-inits this
            proj_b=jnp.zeros((model_dim,), dtype),
        ))
    inner = res_heads * res_dim_head
    p["latents"] = nrm(next(keys), (num_latents, model_dim), 1.0)
    p["res_layers"] = []
    for _ in range(res_depth):
        p["res_layers"].append(dict(
            wq=nrm(next(keys), (model_dim, inner)),
            wkv=nrm(next(keys), (model_dim, 2 * inner)),
            wo=nrm(next(keys), (inner, model_dim)),
            ff_w1=nrm(next(keys), (model_dim, ff_mult * model_dim)),
            ff_b1=jnp.zeros((ff_mult * model_dim,), dtype),
            ff_w2=nrm(next(keys), (ff_mult * model_dim, model_dim)),
            ff_b2=jnp.zeros((model_dim,), dtype),
        ))
    p["res_norm_g"] = jnp.ones((model_dim,), dtype)
    return p


def prepare_params(raw, *, enc_heads=4, enc_groups=32, compute_dtype=COMPUTE_DTYPE):
    """One-time host-side weight preparation: fold GN affine into QKV, permute QKV columns to
    head-major [Q|K|V], build group-membership masks, cast weights to bf16, reshape biases."""
    Cin, C = raw["enc_init_w"].shape
    G, H = enc_groups, enc_heads
    Cg, ch = C // G, C // H

    grp = np.repeat(np.arange(G), Cg)                                        # (C,)
    member = (grp[:, None] == np.arange(G)[None, :]).astype(np.float32)      # (C, G)
    member_t = np.ascontiguousarray(member.T)                                # (G, C)

    q_idx = np.concatenate([np.arange(h * 3 * ch, h * 3 * ch + ch) for h in range(H)])
    perm = np.concatenate([q_idx, q_idx + ch, q_idx + 2 * ch])               # interleaved -> [Q|K|V]

    enc = {
        "init_w": raw["enc_init_w"].astype(compute_dtype),
        "init_b": raw["enc_init_b"].reshape(1, C).astype(jnp.float32),
        "member": jnp.asarray(member),
        "member_t": jnp.asarray(member_t),
        "blocks": [],
    }
    for blk in raw["enc_blocks"]:
        gamma = blk["gn_g"].astype(jnp.float32)
        beta = blk["gn_b"].astype(jnp.float32)
        w = blk["qkv_w"].astype(jnp.float32)
        b = blk["qkv_b"].astype(jnp.float32)
        # (xn*gamma + beta) @ W + b  ==  xn @ (gamma[:,None]*W) + (beta @ W + b)
        w_f = w * gamma[:, None]
        b_f = b + beta @ w
        enc["blocks"].append(dict(
            qkv_w=w_f[:, perm].astype(compute_dtype),
            qkv_b=b_f[perm].reshape(1, 3 * C).astype(jnp.float32),
            proj_w=blk["proj_w"].astype(compute_dtype),
            proj_b=blk["proj_b"].reshape(1, C).astype(jnp.float32),
        ))

    res_layers = []
    for layer in raw["res_layers"]:
        Hf = layer["ff_w1"].shape[1]
        res_layers.append(dict(
            wq=layer["wq"].astype(compute_dtype),
            wkv=layer["wkv"].astype(compute_dtype),
            wo=layer["wo"].astype(compute_dtype),
            ff_w1=layer["ff_w1"].astype(compute_dtype),
            ff_b1=layer["ff_b1"].reshape(1, Hf).astype(jnp.float32),
            ff_w2=layer["ff_w2"].astype(compute_dtype),
            ff_b2=layer["ff_b2"].reshape(1, C).astype(jnp.float32),
        ))
    return dict(enc=enc,
                latents=raw["latents"].astype(jnp.float32),
                res_layers=res_layers,
                res_norm_g=raw["res_norm_g"].reshape(1, C).astype(jnp.float32))


if __name__ == "__main__":
    B, IN_DIM, T = 2, 4, 16
    MODEL_DIM, NUM_LATENTS = 32, 8

    key = jax.random.PRNGKey(0)
    k_x, k_p = jax.random.split(key)
    x = jax.random.normal(k_x, (B, IN_DIM, T), dtype=jnp.float32)   # (B, C, T) NCW
    raw_params = init_params(k_p, IN_DIM, MODEL_DIM, NUM_LATENTS)
    prepared = prepare_params(raw_params, enc_heads=4, enc_groups=32)

    out = perceiver_conditioner(x, prepared, enc_heads=4, res_heads=8, res_dim_head=64)
    out = jax.block_until_ready(out)

    assert out.shape == (B, NUM_LATENTS, MODEL_DIM), out.shape
    assert bool(jnp.all(jnp.isfinite(out)))
    print("KERNEL_OK")
</pallas_src>

<mosaic_0001>
module attributes {stable_mosaic.version = 11 : i64} {
  func.func @_enc_first_block_kernel(%arg0: i32, %arg1: memref<1x16x4xf32, #tpu.memory_space<vmem>>, %arg2: memref<4x32xbf16, #tpu.memory_space<vmem>>, %arg3: memref<1x32xf32, #tpu.memory_space<vmem>>, %arg4: memref<32x32xf32, #tpu.memory_space<vmem>>, %arg5: memref<32x32xf32, #tpu.memory_space<vmem>>, %arg6: memref<32x96xbf16, #tpu.memory_space<vmem>>, %arg7: memref<1x96xf32, #tpu.memory_space<vmem>>, %arg8: memref<32x32xbf16, #tpu.memory_space<vmem>>, %arg9: memref<1x32xf32, #tpu.memory_space<vmem>>, %arg10: memref<1x16x32xf32, #tpu.memory_space<vmem>>) attributes {dimension_semantics = [#tpu.dimension_semantics<parallel>], iteration_bounds = array<i64: 2>, scalar_prefetch = 0 : i64, scratch_operands = 0 : i64, tpu.core_type = #tpu.core_type<tc>, window_params = [{transform_indices = @transform_0, window_bounds = array<i64: 1, 16, 4>}, {pipeline_mode = #tpu.pipeline_mode<synchronous>, transform_indices = @transform_1, window_bounds = array<i64: 4, 32>}, {pipeline_mode = #tpu.pipeline_mode<synchronous>, transform_indices = @transform_2, window_bounds = array<i64: 1, 32>}, {pipeline_mode = #tpu.pipeline_mode<synchronous>, transform_indices = @transform_3, window_bounds = array<i64: 32, 32>}, {pipeline_mode = #tpu.pipeline_mode<synchronous>, transform_indices = @transform_4, window_bounds = array<i64: 32, 32>}, {pipeline_mode = #tpu.pipeline_mode<synchronous>, transform_indices = @transform_5, window_bounds = array<i64: 32, 96>}, {pipeline_mode = #tpu.pipeline_mode<synchronous>, transform_indices = @transform_6, window_bounds = array<i64: 1, 96>}, {pipeline_mode = #tpu.pipeline_mode<synchronous>, transform_indices = @transform_7, window_bounds = array<i64: 32, 32>}, {pipeline_mode = #tpu.pipeline_mode<synchronous>, transform_indices = @transform_8, window_bounds = array<i64: 1, 32>}, {transform_indices = @transform_9, window_bounds = array<i64: 1, 16, 32>}]} {
    %c0 = arith.constant 0 : index
    %c0_0 = arith.constant 0 : index
    %c0_1 = arith.constant 0 : index
    %0 = vector.load %arg1[%c0, %c0_0, %c0_1] : memref<1x16x4xf32, #tpu.memory_space<vmem>>, vector<1x16x4xf32>
    %1 = vector.shape_cast %0 : vector<1x16x4xf32> to vector<16x4xf32>
    %2 = arith.truncf %1 : vector<16x4xf32> to vector<16x4xbf16>
    %c0_2 = arith.constant 0 : index
    %c0_3 = arith.constant 0 : index
    %3 = vector.load %arg2[%c0_2, %c0_3] : memref<4x32xbf16, #tpu.memory_space<vmem>>, vector<4x32xbf16>
    %cst = arith.constant dense<0.000000e+00> : vector<16x32xf32>
    %4 = tpu.matmul %2, %3, %cst {dimension_numbers = #tpu.dot_dimension_numbers<[1], [0], [0], [1], [0, 0, 1, 1], [], []>} : vector<16x4xbf16>, vector<4x32xbf16>, vector<16x32xf32> -> vector<16x32xf32>
    %c0_4 = arith.constant 0 : index
    %c0_5 = arith.constant 0 : index
    %5 = vector.load %arg3[%c0_4, %c0_5] : memref<1x32xf32, #tpu.memory_space<vmem>>, vector<1x32xf32>
    %6 = vector.broadcast %5 : vector<1x32xf32> to vector<16x32xf32>
    %7 = arith.addf %4, %6 : vector<16x32xf32>
    %c0_6 = arith.constant 0 : index
    %c0_7 = arith.constant 0 : index
    %8 = vector.load %arg4[%c0_6, %c0_7] : memref<32x32xf32, #tpu.memory_space<vmem>>, vector<32x32xf32>
    %c0_8 = arith.constant 0 : index
    %c0_9 = arith.constant 0 : index
    %9 = vector.load %arg5[%c0_8, %c0_9] : memref<32x32xf32, #tpu.memory_space<vmem>>, vector<32x32xf32>
    %c0_10 = arith.constant 0 : index
    %c0_11 = arith.constant 0 : index
    %10 = vector.load %arg6[%c0_10, %c0_11] : memref<32x96xbf16, #tpu.memory_space<vmem>>, vector<32x96xbf16>
    %c0_12 = arith.constant 0 : index
    %c0_13 = arith.constant 0 : index
    %11 = vector.load %arg7[%c0_12, %c0_13] : memref<1x96xf32, #tpu.memory_space<vmem>>, vector<1x96xf32>
    %c0_14 = arith.constant 0 : index
    %c0_15 = arith.constant 0 : index
    %12 = vector.load %arg8[%c0_14, %c0_15] : memref<32x32xbf16, #tpu.memory_space<vmem>>, vector<32x32xbf16>
    %c0_16 = arith.constant 0 : index
    %c0_17 = arith.constant 0 : index
    %13 = vector.load %arg9[%c0_16, %c0_17] : memref<1x32xf32, #tpu.memory_space<vmem>>, vector<1x32xf32>
    %cst_18 = arith.constant dense<0.000000e+00> : vector<32xf32>
    %14 = vector.multi_reduction <add>, %7, %cst_18 [0] : vector<16x32xf32> to vector<32xf32>
    %15 = vector.shape_cast %14 : vector<32xf32> to vector<1x32xf32>
    %cst_19 = arith.constant dense<0.000000e+00> : vector<1x32xf32>
    %16 = tpu.matmul %15, %8, %cst_19 {dimension_numbers = #tpu.dot_dimension_numbers<[1], [0], [0], [1], [0, 0, 1, 1], [], []>} : vector<1x32xf32>, vector<32x32xf32>, vector<1x32xf32> -> vector<1x32xf32>
    %cst_20 = arith.constant 1.600000e+01 : f32
    %17 = vector.broadcast %cst_20 : f32 to vector<1x32xf32>
    %18 = arith.divf %16, %17 : vector<1x32xf32>
    %cst_21 = arith.constant dense<0.000000e+00> : vector<1x32xf32>
    %19 = tpu.matmul %18, %9, %cst_21 {dimension_numbers = #tpu.dot_dimension_numbers<[1], [0], [0], [1], [0, 0, 1, 1], [], []>} : vector<1x32xf32>, vector<32x32xf32>, vector<1x32xf32> -> vector<1x32xf32>
    %20 = vector.broadcast %19 : vector<1x32xf32> to vector<16x32xf32>
    %21 = arith.subf %7, %20 : vector<16x32xf32>
    %22 = arith.mulf %21, %21 : vector<16x32xf32>
    %cst_22 = arith.constant dense<0.000000e+00> : vector<32xf32>
    %23 = vector.multi_reduction <add>, %22, %cst_22 [0] : vector<16x32xf32> to vector<32xf32>
    %24 = vector.shape_cast %23 : vector<32xf32> to vector<1x32xf32>
    %cst_23 = arith.constant dense<0.000000e+00> : vector<1x32xf32>
    %25 = tpu.matmul %24, %8, %cst_23 {dimension_numbers = #tpu.dot_dimension_numbers<[1], [0], [0], [1], [0, 0, 1, 1], [], []>} : vector<1x32xf32>, vector<32x32xf32>, vector<1x32xf32> -> vector<1x32xf32>
    %cst_24 = arith.constant 1.600000e+01 : f32
    %26 = vector.broadcast %cst_24 : f32 to vector<1x32xf32>
    %27 = arith.divf %25, %26 : vector<1x32xf32>
    %cst_25 = arith.constant 9.99999974E-6 : f32
    %28 = vector.broadcast %cst_25 : f32 to vector<1x32xf32>
    %29 = arith.addf %27, %28 : vector<1x32xf32>
    %30 = math.rsqrt %29 : vector<1x32xf32>
    %cst_26 = arith.constant dense<0.000000e+00> : vector<1x32xf32>
    %31 = tpu.matmul %30, %9, %cst_26 {dimension_numbers = #tpu.dot_dimension_numbers<[1], [0], [0], [1], [0, 0, 1, 1], [], []>} : vector<1x32xf32>, vector<32x32xf32>, vector<1x32xf32> -> vector<1x32xf32>
    %32 = vector.broadcast %31 : vector<1x32xf32> to vector<16x32xf32>
    %33 = arith.mulf %21, %32 : vector<16x32xf32>
    %34 = arith.truncf %33 : vector<16x32xf32> to vector<16x32xbf16>
    %cst_27 = arith.constant dense<0.000000e+00> : vector<16x96xf32>
    %35 = tpu.matmul %34, %10, %cst_27 {dimension_numbers = #tpu.dot_dimension_numbers<[1], [0], [0], [1], [0, 0, 1, 1], [], []>} : vector<16x32xbf16>, vector<32x96xbf16>, vector<16x96xf32> -> vector<16x96xf32>
    %36 = vector.broadcast %11 : vector<1x96xf32> to vector<16x96xf32>
    %37 = arith.addf %35, %36 : vector<16x96xf32>
    %38 = vector.extract_strided_slice %37 {offsets = [0, 0], sizes = [16, 32], strides = [1, 1]} : vector<16x96xf32> to vector<16x32xf32>
    %39 = arith.truncf %38 : vector<16x32xf32> to vector<16x32xbf16>
    %40 = vector.extract_strided_slice %37 {offsets = [0, 32], sizes = [16, 32], strides = [1, 1]} : vector<16x96xf32> to vector<16x32xf32>
    %41 = arith.truncf %40 : vector<16x32xf32> to vector<16x32xbf16>
    %42 = vector.extract_strided_slice %37 {offsets = [0, 64], sizes = [16, 32], strides = [1, 1]} : vector<16x96xf32> to vector<16x32xf32>
    %43 = arith.truncf %42 : vector<16x32xf32> to vector<16x32xbf16>
    %cst_28 = arith.constant 0.000000e+00 : f32
    %44 = vector.broadcast %cst_28 : f32 to vector<16x32xf32>
    %45 = vector.extract_strided_slice %39 {offsets = [0, 0], sizes = [16, 8], strides = [1, 1]} : vector<16x32xbf16> to vector<16x8xbf16>
    %cst_29 = arith.constant 0xFF800000 : f32
    %46 = vector.broadcast %cst_29 : f32 to vector<16x1xf32>
    %cst_30 = arith.constant 0.000000e+00 : f32
    %47 = vector.broadcast %cst_30 : f32 to vector<16x1xf32>
    %cst_31 = arith.constant 0.000000e+00 : f32
    %48 = vector.broadcast %cst_31 : f32 to vector<16x8xf32>
    %49 = vector.extract_strided_slice %41 {offsets = [0, 0], sizes = [16, 8], strides = [1, 1]} : vector<16x32xbf16> to vector<16x8xbf16>
    %50 = vector.extract_strided_slice %43 {offsets = [0, 0], sizes = [16, 8], strides = [1, 1]} : vector<16x32xbf16> to vector<16x8xbf16>
    %cst_32 = arith.constant dense<0.000000e+00> : vector<16x16xf32>
    %51 = tpu.matmul %45, %49, %cst_32 {dimension_numbers = #tpu.dot_dimension_numbers<[1], [1], [0], [0], [0, 0, 1, 0], [], []>} : vector<16x8xbf16>, vector<16x8xbf16>, vector<16x16xf32> -> vector<16x16xf32>
    %cst_33 = arith.constant 0.353553385 : f32
    %52 = vector.broadcast %cst_33 : f32 to vector<16x16xf32>
    %53 = arith.mulf %51, %52 : vector<16x16xf32>
    %cst_34 = arith.constant dense<0xFF800000> : vector<16xf32>
    %54 = vector.multi_reduction <maximumf>, %53, %cst_34 [1] : vector<16x16xf32> to vector<16xf32>
    %55 = vector.shape_cast %54 : vector<16xf32> to vector<16x1xf32>
    %56 = arith.maximumf %46, %55 : vector<16x1xf32>
    %57 = arith.subf %46, %56 : vector<16x1xf32>
    %58 = math.exp %57 : vector<16x1xf32>
    %59 = vector.broadcast %56 : vector<16x1xf32> to vector<16x16xf32>
    %60 = arith.subf %53, %59 : vector<16x16xf32>
    %61 = math.exp %60 : vector<16x16xf32>
    %62 = arith.mulf %58, %47 : vector<16x1xf32>
    %cst_35 = arith.constant dense<0.000000e+00> : vector<16xf32>
    %63 = vector.multi_reduction <add>, %61, %cst_35 [1] : vector<16x16xf32> to vector<16xf32>
    %64 = vector.shape_cast %63 : vector<16xf32> to vector<16x1xf32>
    %65 = arith.addf %62, %64 : vector<16x1xf32>
    %66 = vector.broadcast %58 : vector<16x1xf32> to vector<16x8xf32>
    %67 = arith.mulf %66, %48 : vector<16x8xf32>
    %68 = arith.truncf %61 : vector<16x16xf32> to vector<16x16xbf16>
    %cst_36 = arith.constant dense<0.000000e+00> : vector<16x8xf32>
    %69 = tpu.matmul %68, %50, %cst_36 {dimension_numbers = #tpu.dot_dimension_numbers<[1], [0], [0], [1], [0, 0, 1, 1], [], []>} : vector<16x16xbf16>, vector<16x8xbf16>, vector<16x8xf32> -> vector<16x8xf32>
    %70 = arith.addf %67, %69 : vector<16x8xf32>
    %71 = tpu.reciprocal %65 {approx = true} : vector<16x1xf32> -> vector<16x1xf32>
    %72 = vector.broadcast %71 : vector<16x1xf32> to vector<16x8xf32>
    %73 = arith.mulf %70, %72 : vector<16x8xf32>
    %74 = arith.truncf %73 : vector<16x8xf32> to vector<16x8xbf16>
    %75 = vector.extract_strided_slice %12 {offsets = [0, 0], sizes = [8, 32], strides = [1, 1]} : vector<32x32xbf16> to vector<8x32xbf16>
    %cst_37 = arith.constant dense<0.000000e+00> : vector<16x32xf32>
    %76 = tpu.matmul %74, %75, %cst_37 {dimension_numbers = #tpu.dot_dimension_numbers<[1], [0], [0], [1], [0, 0, 1, 1], [], []>} : vector<16x8xbf16>, vector<8x32xbf16>, vector<16x32xf32> -> vector<16x32xf32>
    %77 = arith.addf %44, %76 : vector<16x32xf32>
    %78 = vector.extract_strided_slice %39 {offsets = [0, 8], sizes = [16, 8], strides = [1, 1]} : vector<16x32xbf16> to vector<16x8xbf16>
    %cst_38 = arith.constant 0xFF800000 : f32
    %79 = vector.broadcast %cst_38 : f32 to vector<16x1xf32>
    %cst_39 = arith.constant 0.000000e+00 : f32
    %80 = vector.broadcast %cst_39 : f32 to vector<16x1xf32>
    %cst_40 = arith.constant 0.000000e+00 : f32
    %81 = vector.broadcast %cst_40 : f32 to vector<16x8xf32>
    %82 = vector.extract_strided_slice %41 {offsets = [0, 8], sizes = [16, 8], strides = [1, 1]} : vector<16x32xbf16> to vector<16x8xbf16>
    %83 = vector.extract_strided_slice %43 {offsets = [0, 8], sizes = [16, 8], strides = [1, 1]} : vector<16x32xbf16> to vector<16x8xbf16>
    %cst_41 = arith.constant dense<0.000000e+00> : vector<16x16xf32>
    %84 = tpu.matmul %78, %82, %cst_41 {dimension_numbers = #tpu.dot_dimension_numbers<[1], [1], [0], [0], [0, 0, 1, 0], [], []>} : vector<16x8xbf16>, vector<16x8xbf16>, vector<16x16xf32> -> vector<16x16xf32>
    %cst_42 = arith.constant 0.353553385 : f32
    %85 = vector.broadcast %cst_42 : f32 to vector<16x16xf32>
    %86 = arith.mulf %84, %85 : vector<16x16xf32>
    %cst_43 = arith.constant dense<0xFF800000> : vector<16xf32>
    %87 = vector.multi_reduction <maximumf>, %86, %cst_43 [1] : vector<16x16xf32> to vector<16xf32>
    %88 = vector.shape_cast %87 : vector<16xf32> to vector<16x1xf32>
    %89 = arith.maximumf %79, %88 : vector<16x1xf32>
    %90 = arith.subf %79, %89 : vector<16x1xf32>
    %91 = math.exp %90 : vector<16x1xf32>
    %92 = vector.broadcast %89 : vector<16x1xf32> to vector<16x16xf32>
    %93 = arith.subf %86, %92 : vector<16x16xf32>
    %94 = math.exp %93 : vector<16x16xf32>
    %95 = arith.mulf %91, %80 : vector<16x1xf32>
    %cst_44 = arith.constant dense<0.000000e+00> : vector<16xf32>
    %96 = vector.multi_reduction <add>, %94, %cst_44 [1] : vector<16x16xf32> to vector<16xf32>
    %97 = vector.shape_cast %96 : vector<16xf32> to vector<16x1xf32>
    %98 = arith.addf %95, %97 : vector<16x1xf32>
    %99 = vector.broadcast %91 : vector<16x1xf32> to vector<16x8xf32>
    %100 = arith.mulf %99, %81 : vector<16x8xf32>
    %101 = arith.truncf %94 : vector<16x16xf32> to vector<16x16xbf16>
    %cst_45 = arith.constant dense<0.000000e+00> : vector<16x8xf32>
    %102 = tpu.matmul %101, %83, %cst_45 {dimension_numbers = #tpu.dot_dimension_numbers<[1], [0], [0], [1], [0, 0, 1, 1], [], []>} : vector<16x16xbf16>, vector<16x8xbf16>, vector<16x8xf32> -> vector<16x8xf32>
    %103 = arith.addf %100, %102 : vector<16x8xf32>
    %104 = tpu.reciprocal %98 {approx = true} : vector<16x1xf32> -> vector<16x1xf32>
    %105 = vector.broadcast %104 : vector<16x1xf32> to vector<16x8xf32>
    %106 = arith.mulf %103, %105 : vector<16x8xf32>
    %107 = arith.truncf %106 : vector<16x8xf32> to vector<16x8xbf16>
    %108 = vector.extract_strided_slice %12 {offsets = [8, 0], sizes = [8, 32], strides = [1, 1]} : vector<32x32xbf16> to vector<8x32xbf16>
    %cst_46 = arith.constant dense<0.000000e+00> : vector<16x32xf32>
    %109 = tpu.matmul %107, %108, %cst_46 {dimension_numbers = #tpu.dot_dimension_numbers<[1], [0], [0], [1], [0, 0, 1, 1], [], []>} : vector<16x8xbf16>, vector<8x32xbf16>, vector<16x32xf32> -> vector<16x32xf32>
    %110 = arith.addf %77, %109 : vector<16x32xf32>
    %111 = vector.extract_strided_slice %39 {offsets = [0, 16], sizes = [16, 8], strides = [1, 1]} : vector<16x32xbf16> to vector<16x8xbf16>
    %cst_47 = arith.constant 0xFF800000 : f32
    %112 = vector.broadcast %cst_47 : f32 to vector<16x1xf32>
    %cst_48 = arith.constant 0.000000e+00 : f32
    %113 = vector.broadcast %cst_48 : f32 to vector<16x1xf32>
    %cst_49 = arith.constant 0.000000e+00 : f32
    %114 = vector.broadcast %cst_49 : f32 to vector<16x8xf32>
    %115 = vector.extract_strided_slice %41 {offsets = [0, 16], sizes = [16, 8], strides = [1, 1]} : vector<16x32xbf16> to vector<16x8xbf16>
    %116 = vector.extract_strided_slice %43 {offsets = [0, 16], sizes = [16, 8], strides = [1, 1]} : vector<16x32xbf16> to vector<16x8xbf16>
    %cst_50 = arith.constant dense<0.000000e+00> : vector<16x16xf32>
    %117 = tpu.matmul %111, %115, %cst_50 {dimension_numbers = #tpu.dot_dimension_numbers<[1], [1], [0], [0], [0, 0, 1, 0], [], []>} : vector<16x8xbf16>, vector<16x8xbf16>, vector<16x16xf32> -> vector<16x16xf32>
    %cst_51 = arith.constant 0.353553385 : f32
    %118 = vector.broadcast %cst_51 : f32 to vector<16x16xf32>
    %119 = arith.mulf %117, %118 : vector<16x16xf32>
    %cst_52 = arith.constant dense<0xFF800000> : vector<16xf32>
    %120 = vector.multi_reduction <maximumf>, %119, %cst_52 [1] : vector<16x16xf32> to vector<16xf32>
    %121 = vector.shape_cast %120 : vector<16xf32> to vector<16x1xf32>
    %122 = arith.maximumf %112, %121 : vector<16x1xf32>
    %123 = arith.subf %112, %122 : vector<16x1xf32>
    %124 = math.exp %123 : vector<16x1xf32>
    %125 = vector.broadcast %122 : vector<16x1xf32> to vector<16x16xf32>
    %126 = arith.subf %119, %125 : vector<16x16xf32>
    %127 = math.exp %126 : vector<16x16xf32>
    %128 = arith.mulf %124, %113 : vector<16x1xf32>
    %cst_53 = arith.constant dense<0.000000e+00> : vector<16xf32>
    %129 = vector.multi_reduction <add>, %127, %cst_53 [1] : vector<16x16xf32> to vector<16xf32>
    %130 = vector.shape_cast %129 : vector<16xf32> to vector<16x1xf32>
    %131 = arith.addf %128, %130 : vector<16x1xf32>
    %132 = vector.broadcast %124 : vector<16x1xf32> to vector<16x8xf32>
    %133 = arith.mulf %132, %114 : vector<16x8xf32>
    %134 = arith.truncf %127 : vector<16x16xf32> to vector<16x16xbf16>
    %cst_54 = arith.constant dense<0.000000e+00> : vector<16x8xf32>
    %135 = tpu.matmul %134, %116, %cst_54 {dimension_numbers = #tpu.dot_dimension_numbers<[1], [0], [0], [1], [0, 0, 1, 1], [], []>} : vector<16x16xbf16>, vector<16x8xbf16>, vector<16x8xf32> -> vector<16x8xf32>
    %136 = arith.addf %133, %135 : vector<16x8xf32>
    %137 = tpu.reciprocal %131 {approx = true} : vector<16x1xf32> -> vector<16x1xf32>
    %138 = vector.broadcast %137 : vector<16x1xf32> to vector<16x8xf32>
    %139 = arith.mulf %136, %138 : vector<16x8xf32>
    %140 = arith.truncf %139 : vector<16x8xf32> to vector<16x8xbf16>
    %141 = vector.extract_strided_slice %12 {offsets = [16, 0], sizes = [8, 32], strides = [1, 1]} : vector<32x32xbf16> to vector<8x32xbf16>
    %cst_55 = arith.constant dense<0.000000e+00> : vector<16x32xf32>
    %142 = tpu.matmul %140, %141, %cst_55 {dimension_numbers = #tpu.dot_dimension_numbers<[1], [0], [0], [1], [0, 0, 1, 1], [], []>} : vector<16x8xbf16>, vector<8x32xbf16>, vector<16x32xf32> -> vector<16x32xf32>
    %143 = arith.addf %110, %142 : vector<16x32xf32>
    %144 = vector.extract_strided_slice %39 {offsets = [0, 24], sizes = [16, 8], strides = [1, 1]} : vector<16x32xbf16> to vector<16x8xbf16>
    %cst_56 = arith.constant 0xFF800000 : f32
    %145 = vector.broadcast %cst_56 : f32 to vector<16x1xf32>
    %cst_57 = arith.constant 0.000000e+00 : f32
    %146 = vector.broadcast %cst_57 : f32 to vector<16x1xf32>
    %cst_58 = arith.constant 0.000000e+00 : f32
    %147 = vector.broadcast %cst_58 : f32 to vector<16x8xf32>
    %148 = vector.extract_strided_slice %41 {offsets = [0, 24], sizes = [16, 8], strides = [1, 1]} : vector<16x32xbf16> to vector<16x8xbf16>
    %149 = vector.extract_strided_slice %43 {offsets = [0, 24], sizes = [16, 8], strides = [1, 1]} : vector<16x32xbf16> to vector<16x8xbf16>
    %cst_59 = arith.constant dense<0.000000e+00> : vector<16x16xf32>
    %150 = tpu.matmul %144, %148, %cst_59 {dimension_numbers = #tpu.dot_dimension_numbers<[1], [1], [0], [0], [0, 0, 1, 0], [], []>} : vector<16x8xbf16>, vector<16x8xbf16>, vector<16x16xf32> -> vector<16x16xf32>
    %cst_60 = arith.constant 0.353553385 : f32
    %151 = vector.broadcast %cst_60 : f32 to vector<16x16xf32>
    %152 = arith.mulf %150, %151 : vector<16x16xf32>
    %cst_61 = arith.constant dense<0xFF800000> : vector<16xf32>
    %153 = vector.multi_reduction <maximumf>, %152, %cst_61 [1] : vector<16x16xf32> to vector<16xf32>
    %154 = vector.shape_cast %153 : vector<16xf32> to vector<16x1xf32>
    %155 = arith.maximumf %145, %154 : vector<16x1xf32>
    %156 = arith.subf %145, %155 : vector<16x1xf32>
    %157 = math.exp %156 : vector<16x1xf32>
    %158 = vector.broadcast %155 : vector<16x1xf32> to vector<16x16xf32>
    %159 = arith.subf %152, %158 : vector<16x16xf32>
    %160 = math.exp %159 : vector<16x16xf32>
    %161 = arith.mulf %157, %146 : vector<16x1xf32>
    %cst_62 = arith.constant dense<0.000000e+00> : vector<16xf32>
    %162 = vector.multi_reduction <add>, %160, %cst_62 [1] : vector<16x16xf32> to vector<16xf32>
    %163 = vector.shape_cast %162 : vector<16xf32> to vector<16x1xf32>
    %164 = arith.addf %161, %163 : vector<16x1xf32>
    %165 = vector.broadcast %157 : vector<16x1xf32> to vector<16x8xf32>
    %166 = arith.mulf %165, %147 : vector<16x8xf32>
    %167 = arith.truncf %160 : vector<16x16xf32> to vector<16x16xbf16>
    %cst_63 = arith.constant dense<0.000000e+00> : vector<16x8xf32>
    %168 = tpu.matmul %167, %149, %cst_63 {dimension_numbers = #tpu.dot_dimension_numbers<[1], [0], [0], [1], [0, 0, 1, 1], [], []>} : vector<16x16xbf16>, vector<16x8xbf16>, vector<16x8xf32> -> vector<16x8xf32>
    %169 = arith.addf %166, %168 : vector<16x8xf32>
    %170 = tpu.reciprocal %164 {approx = true} : vector<16x1xf32> -> vector<16x1xf32>
    %171 = vector.broadcast %170 : vector<16x1xf32> to vector<16x8xf32>
    %172 = arith.mulf %169, %171 : vector<16x8xf32>
    %173 = arith.truncf %172 : vector<16x8xf32> to vector<16x8xbf16>
    %174 = vector.extract_strided_slice %12 {offsets = [24, 0], sizes = [8, 32], strides = [1, 1]} : vector<32x32xbf16> to vector<8x32xbf16>
    %cst_64 = arith.constant dense<0.000000e+00> : vector<16x32xf32>
    %175 = tpu.matmul %173, %174, %cst_64 {dimension_numbers = #tpu.dot_dimension_numbers<[1], [0], [0], [1], [0, 0, 1, 1], [], []>} : vector<16x8xbf16>, vector<8x32xbf16>, vector<16x32xf32> -> vector<16x32xf32>
    %176 = arith.addf %143, %175 : vector<16x32xf32>
    %177 = arith.addf %7, %176 : vector<16x32xf32>
    %178 = vector.broadcast %13 : vector<1x32xf32> to vector<16x32xf32>
    %179 = arith.addf %177, %178 : vector<16x32xf32>
    %c0_65 = arith.constant 0 : index
    %c0_66 = arith.constant 0 : index
    %c0_67 = arith.constant 0 : index
    %180 = vector.load %arg10[%c0_65, %c0_66, %c0_67] : memref<1x16x32xf32, #tpu.memory_space<vmem>>, vector<1x16x32xf32>
    %181 = vector.shape_cast %180 : vector<1x16x32xf32> to vector<16x32xf32>
    %182 = vector.shape_cast %179 : vector<16x32xf32> to vector<1x16x32xf32>
    tpu.vector_store %arg10[%c0_65, %c0_66, %c0_67], %182 {strides = array<i32>} : memref<1x16x32xf32, #tpu.memory_space<vmem>>, vector<1x16x32xf32>,
    return
  }
  func.func @transform_0(%arg0: i32) -> (i32, i32, i32) {
    %c0_i32 = arith.constant 0 : i32
    %c0_i32_0 = arith.constant 0 : i32
    %c0_i32_1 = arith.constant 0 : i32
    return %arg0, %c0_i32, %c0_i32_0 : i32, i32, i32
  }
  func.func @transform_1(%arg0: i32) -> (i32, i32) {
    %c0_i32 = arith.constant 0 : i32
    %c0_i32_0 = arith.constant 0 : i32
    %c0_i32_1 = arith.constant 0 : i32
    return %c0_i32, %c0_i32_0 : i32, i32
  }
  func.func @transform_2(%arg0: i32) -> (i32, i32) {
    %c0_i32 = arith.constant 0 : i32
    %c0_i32_0 = arith.constant 0 : i32
    %c0_i32_1 = arith.constant 0 : i32
    return %c0_i32, %c0_i32_0 : i32, i32
  }
  func.func @transform_3(%arg0: i32) -> (i32, i32) {
    %c0_i32 = arith.constant 0 : i32
    %c0_i32_0 = arith.constant 0 : i32
    %c0_i32_1 = arith.constant 0 : i32
    return %c0_i32, %c0_i32_0 : i32, i32
  }
  func.func @transform_4(%arg0: i32) -> (i32, i32) {
    %c0_i32 = arith.constant 0 : i32
    %c0_i32_0 = arith.constant 0 : i32
    %c0_i32_1 = arith.constant 0 : i32
    return %c0_i32, %c0_i32_0 : i32, i32
  }
  func.func @transform_5(%arg0: i32) -> (i32, i32) {
    %c0_i32 = arith.constant 0 : i32
    %c0_i32_0 = arith.constant 0 : i32
    %c0_i32_1 = arith.constant 0 : i32
    return %c0_i32, %c0_i32_0 : i32, i32
  }
  func.func @transform_6(%arg0: i32) -> (i32, i32) {
    %c0_i32 = arith.constant 0 : i32
    %c0_i32_0 = arith.constant 0 : i32
    %c0_i32_1 = arith.constant 0 : i32
    return %c0_i32, %c0_i32_0 : i32, i32
  }
  func.func @transform_7(%arg0: i32) -> (i32, i32) {
    %c0_i32 = arith.constant 0 : i32
    %c0_i32_0 = arith.constant 0 : i32
    %c0_i32_1 = arith.constant 0 : i32
    return %c0_i32, %c0_i32_0 : i32, i32
  }
  func.func @transform_8(%arg0: i32) -> (i32, i32) {
    %c0_i32 = arith.constant 0 : i32
    %c0_i32_0 = arith.constant 0 : i32
    %c0_i32_1 = arith.constant 0 : i32
    return %c0_i32, %c0_i32_0 : i32, i32
  }
  func.func @transform_9(%arg0: i32) -> (i32, i32, i32) {
    %c0_i32 = arith.constant 0 : i32
    %c0_i32_0 = arith.constant 0 : i32
    %c0_i32_1 = arith.constant 0 : i32
    return %arg0, %c0_i32, %c0_i32_0 : i32, i32, i32
  }
}

</mosaic_0001>

<bundles_post_ra>
// kernel: tpu_custom_call.1
= control target key start
LH: loop header
LB: loop body
LE: loop exit
PB: predicated region body
PF: predicated region fallthrough
CT: control target
= control target key end

     0   :  { %s3219_s0 = inlined_call_operand.hbm [shape: f32[2,16,4], index: 0, kind: input, shape index: {}]   ;;  %s3220_s1 = inlined_call_operand.hbm [shape: bf16[4,32], index: 1, kind: input, shape index: {}]   ;;  %s3221_s2 = inlined_call_operand.hbm [shape: f32[1,32], index: 2, kind: input, shape index: {}]   ;;  %s3222_s3 = inlined_call_operand.hbm [shape: f32[32,32], index: 3, kind: input, shape index: {}]   ;;  %s3223_s4 = inlined_call_operand.hbm [shape: f32[32,32], index: 4, kind: input, shape index: {}]   ;;  %s3224_s5 = inlined_call_operand.hbm [shape: bf16[32,96], index: 5, kind: input, shape index: {}]   ;;  %s3225_s6 = inlined_call_operand.hbm [shape: f32[1,96], index: 6, kind: input, shape index: {}]   ;;  %s3226_s7 = inlined_call_operand.hbm [shape: bf16[32,32], index: 7, kind: input, shape index: {}]   ;;  %s3227_s8 = inlined_call_operand.hbm [shape: f32[1,32], index: 8, kind: input, shape index: {}]   ;;  %s3228_s9 = inlined_call_operand.hbm [shape: f32[2,16,32], index: 9, kind: output, shape index: {}]  }
   0x1   :  { %3237 = sst [smem:[#allocation24_spill]] %s3220_s1 }
   0x2   :  { %3238 = sst [smem:[#allocation25_spill]] %s3222_s3 }
   0x3   :  { %3239 = sst [smem:[#allocation26_spill]] %s3228_s9 }
   0x4   :  { %14 = vsyncpa [#allocation3], 0 }
   0x5   :  { %16 = vsyncpa [#allocation3 + $0x1], 0 }
   0x6   :  { %17 = vsyncpa [#allocation6], 0 }
   0x7   :  { %18 = vsyncpa [#allocation9], 0 }
   0x8   :  { %19 = vsyncpa [#allocation12], 0 }
   0x9   :  { %20 = vsyncpa [#allocation15], 0 }
   0xa   :  { %21 = vsyncpa [#allocation4], 0 }
   0xb   :  { %23 = vsyncpa [#allocation4 + $0x1], 0  ;;  %s2720_s30 = smov 0   ;;  %s2722_s10 = smov 0  }
   0xc   :  { %s2724_s11 = smov 0   ;;  %s2726_s12 = smov 0  }
   0xd LB: > { %s2640_s13 = smov [#allocation5]   ;;  %s2741_s15 = sadd.s32 4294967295, %s2638_s12   ;;  %s2638_s12 = sphi %s2726_s12, %s3269_s12   ;;  %s2634_s11 = sphi %s2724_s11, %s3268_s11   ;;  %s2630_s10 = sphi %s2722_s10, %s3267_s10   ;;  %s2626_s30 = sphi %s2720_s30, %s3266_s30  }
   0xe   : > { %s267_s14 = sshll.u32 %s2640_s13, 4  ;;  %p1846_p0 = scmp.ge.s32.totalorder %s2638_s12, 1  ;;  %s268_s14 = int_to_ptr.vmem [resolvable:$true] %s267_s14 }
   0xf   : > { %p3229_p1 = scmp.eq.s32.totalorder %s2741_s15, 0  ;;  %p254_p2 = scmp.lt.s32.totalorder %s2638_s12, 3 }
  0x10   : > { %s2641_s17 = smov [#allocation8]   ;;  %s2642_s20 = smov [#allocation11]  }
  0x11   : > { %p2746_p3 = pnand %p1846_p0, %p254_p2  ;;  %s288_s18 = sshll.u32 %s2641_s17, 4  ;;  %s2753_s18 = int_to_ptr.vmem [resolvable:$true] %s288_s18 }
  0x12   : > { %s314_s21 = sshll.u32 %s2642_s20, 4  ;;  %s3242_s1 = sld [smem:[#allocation24_spill]]  ;;  %s2761_s21 = int_to_ptr.vmem [resolvable:$true] %s314_s21 }
  0x13   : > { %s3240_s16 = scalar_select %p2746_p3, 1, 0 }
  0x14   : > { %p2139_p5 = pneg %p2746_p3 }
  0x16   : > { %p2757_p6 = pnand %p2139_p5, %p3229_p1 }
  0x18   : > { %s2302_s24 = scalar_lea.hbm %s3242_s1, 32  ;;  %p2771_p8 = pneg %p2757_p6 }
  0x19   : > { %p2303_p7 = scmp.ne.s32.totalorder %s3242_s1, %s2302_s24  ;;  %p2309_p11 = scmp.lt.u32.totalorder %s2302_s24, %s3242_s1 }
  0x1b   : > { %p2305_p9 = pnand %p2771_p8, %p2303_p7 }
  0x1d   : > { %p2306_p10 = pneg %p2305_p9 }
  0x1f   : > { %p2311_p12 = pnand %p2309_p11, %p2306_p10 }
  0x21   : > { %2314 = shalt.err (!%p2311_p12)
}
  0x22   : > { %s2315_s13 = scalar_lea.vmem %s268_s14, 32  ;;  %p2323_p5 = scmp.lt.s32.totalorder %s268_s14, %s268_s14 }
  0x23   : > { %p2316_p13 = scmp.ne.s32.totalorder %s268_s14, %s2315_s13  ;;  %p2324_p4 = scmp.lt.s32.totalorder %s2315_s13, %s2315_s13 }
  0x25   : > { %p2318_p0 = pnand %p2316_p13, %p2771_p8  ;;  %p2325_p1 = por %p2324_p4, %p2323_p5 }
  0x27   : > { %p2319_p2 = pneg %p2318_p0 }
  0x29   : > { %p2326_p3 = pnand %p2325_p1, %p2319_p2 }
  0x2b   : > { %2329 = shalt.err (!%p2326_p3)
}
  0x2c   : > { %2142 = dma.hbm_to_vmem [thread:$0]  (!%p2757_p6), %s3242_s1, 32, %s268_s14, [#allocation6]  }
  0x2d   : > { %s3244_s3 = sld [smem:[#allocation25_spill]] }
  0x33   : > { %s2330_s24 = scalar_lea.hbm %s3244_s3, 512 }
  0x34   : > { %p2331_p7 = scmp.ne.s32.totalorder %s3244_s3, %s2330_s24  ;;  %p2337_p1 = scmp.lt.u32.totalorder %s2330_s24, %s3244_s3 }
  0x36   : > { %p2333_p9 = pnand %p2331_p7, %p2771_p8 }
  0x38   : > { %p2334_p4 = pneg %p2333_p9 }
  0x3a   : > { %p2339_p3 = pnand %p2337_p1, %p2334_p4 }
  0x3c   : > { %2342 = shalt.err (!%p2339_p3)
}
  0x3d   : > { %s2343_s14 = scalar_lea.vmem %s2753_s18, 512  ;;  %p2351_p13 = scmp.lt.s32.totalorder %s2753_s18, %s2753_s18 }
  0x3e   : > { %p2344_p10 = scmp.ne.s32.totalorder %s2753_s18, %s2343_s14  ;;  %p2352_p0 = scmp.lt.s32.totalorder %s2343_s14, %s2343_s14 }
  0x40   : > { %p2346_p11 = pnand %p2344_p10, %p2771_p8  ;;  %p2353_p2 = por %p2352_p0, %p2351_p13 }
  0x42   : > { %p2347_p12 = pneg %p2346_p11 }
  0x44   : > { %p2354_p5 = pnand %p2353_p2, %p2347_p12 }
  0x46   : > { %2357 = shalt.err (!%p2354_p5)
}
  0x47   : > { %s3231_s13 = smov 128   ;;  %s3233_s17 = smov 8  }
  0x48   : > { %2148 = dma.hbm_to_vmem [thread:$0]  (!%p2757_p6), %s3244_s3, 512, %s2753_s18, [#allocation9], %s3231_s13, %s3231_s13, %s3233_s17  }
  0x49   : > { %s2358_s25 = scalar_lea.hbm %s3224_s5, 256 }
  0x4a   : > { %p2359_p7 = scmp.ne.s32.totalorder %s3224_s5, %s2358_s25  ;;  %p2365_p1 = scmp.lt.u32.totalorder %s2358_s25, %s3224_s5 }
  0x4c   : > { %p2361_p9 = pnand %p2359_p7, %p2771_p8 }
  0x4e   : > { %p2362_p4 = pneg %p2361_p9 }
  0x50   : > { %p2367_p3 = pnand %p2365_p1, %p2362_p4 }
  0x52   : > { %2370 = shalt.err (!%p2367_p3)
}
  0x53   : > { %s2371_s18 = scalar_lea.vmem %s2761_s21, 256  ;;  %p2379_p13 = scmp.lt.s32.totalorder %s2761_s21, %s2761_s21 }
  0x54   : > { %p2372_p10 = scmp.ne.s32.totalorder %s2761_s21, %s2371_s18  ;;  %p2380_p0 = scmp.lt.s32.totalorder %s2371_s18, %s2371_s18 }
  0x56   : > { %p2374_p11 = pnand %p2372_p10, %p2771_p8  ;;  %p2381_p2 = por %p2380_p0, %p2379_p13 }
  0x58   : > { %p2375_p12 = pneg %p2374_p11 }
  0x5a   : > { %p2382_p5 = pnand %p2381_p2, %p2375_p12 }
  0x5c   : > { %2385 = shalt.err (!%p2382_p5)
}
  0x5d   : > { %s2645_s20 = smov 64   ;;  %s2646_s22 = smov 4  }
  0x5e   : > { %2154 = dma.hbm_to_vmem [thread:$0]  (!%p2757_p6), %s3224_s5, 256, %s2761_s21, [#allocation12], %s2645_s20, %s2645_s20, %s2646_s22  }
  0x5f   : > { %s2647_s25 = smov [#allocation14]   ;;  %s2648_s28 = smov [#allocation7]  }
  0x60   : > { %s338_s26 = sshll.u32 %s2647_s25, 4  ;;  %s278_s29 = sshll.u32 %s2648_s28, 4  ;;  %s339_s26 = int_to_ptr.vmem [resolvable:$true] %s338_s26  ;;  %s279_s29 = int_to_ptr.vmem [resolvable:$true] %s278_s29 }
  0x61   : > { %s2386_s13 = scalar_lea.hbm %s3226_s7, 256 }
  0x62   : > { %p2387_p7 = scmp.ne.s32.totalorder %s3226_s7, %s2386_s13  ;;  %p2393_p1 = scmp.lt.u32.totalorder %s2386_s13, %s3226_s7 }
  0x64   : > { %p2389_p9 = pnand %p2387_p7, %p2771_p8 }
  0x66   : > { %p2390_p4 = pneg %p2389_p9 }
  0x68   : > { %p2395_p3 = pnand %p2393_p1, %p2390_p4 }
  0x6a   : > { %2398 = shalt.err (!%p2395_p3)
}
  0x6b   : > { %s2399_s21 = scalar_lea.vmem %s339_s26, 256  ;;  %p2407_p13 = scmp.lt.s32.totalorder %s339_s26, %s339_s26 }
  0x6c   : > { %p2400_p10 = scmp.ne.s32.totalorder %s339_s26, %s2399_s21  ;;  %p2408_p0 = scmp.lt.s32.totalorder %s2399_s21, %s2399_s21 }
  0x6e   : > { %p2402_p11 = pnand %p2400_p10, %p2771_p8  ;;  %p2409_p2 = por %p2408_p0, %p2407_p13 }
  0x70   : > { %p2403_p12 = pneg %p2402_p11 }
  0x72   : > { %p2410_p5 = pnand %p2409_p2, %p2403_p12 }
  0x74   : > { %2413 = shalt.err (!%p2410_p5)
}
  0x75   : > { %2160 = dma.hbm_to_vmem [thread:$0]  (!%p2757_p6), %s3226_s7, 256, %s339_s26, [#allocation15], %s2645_s20, %s2645_s20, %s2646_s22  }
  0x76   : > { %s2414_s13 = scalar_lea.hbm %s3221_s2, 16 }
  0x77   : > { %p2415_p7 = scmp.ne.s32.totalorder %s3221_s2, %s2414_s13  ;;  %p2421_p1 = scmp.lt.u32.totalorder %s2414_s13, %s3221_s2 }
  0x79   : > { %p2417_p9 = pnand %p2415_p7, %p2771_p8 }
  0x7b   : > { %p2418_p4 = pneg %p2417_p9 }
  0x7d   : > { %p2423_p3 = pnand %p2421_p1, %p2418_p4 }
  0x7f   : > { %2426 = shalt.err (!%p2423_p3)
}
  0x80   : > { %s2427_s14 = scalar_lea.vmem %s279_s29, 16  ;;  %s2434_s20 = scalar_lea.vmem %s279_s29, 32 }
  0x81   : > { %p2428_p10 = scmp.ne.s32.totalorder %s279_s29, %s2427_s14  ;;  %p2435_p13 = scmp.lt.s32.totalorder %s279_s29, %s279_s29 }
  0x82   : > { %p2436_p0 = scmp.lt.s32.totalorder %s2434_s20, %s2427_s14 }
  0x83   : > { %p2430_p11 = pnand %p2428_p10, %p2771_p8 }
  0x84   : > { %p2437_p2 = por %p2436_p0, %p2435_p13 }
  0x85   : > { %p2431_p12 = pneg %p2430_p11 }
  0x87   : > { %p2438_p5 = pnand %p2437_p2, %p2431_p12 }
  0x89   : > { %2441 = shalt.err (!%p2438_p5)
}
  0x8a   : > { %2145 = dma.hbm_to_vmem [thread:$0]  (!%p2757_p6), %s3221_s2, 16, %s279_s29, [#allocation6]  }
  0x8b   : > { %s2649_s18 = smov [#allocation10]   ;;  %s2650_s1 = smov [#allocation13]  }
  0x8c   : > { %s301_s21 = sshll.u32 %s2649_s18, 4  ;;  %s328_s17 = sshll.u32 %s2650_s1, 4  ;;  %s302_s21 = int_to_ptr.vmem [resolvable:$true] %s301_s21  ;;  %s329_s17 = int_to_ptr.vmem [resolvable:$true] %s328_s17 }
  0x8d   : > { %s2442_s13 = scalar_lea.hbm %s3223_s4, 512 }
  0x8e   : > { %p2443_p7 = scmp.ne.s32.totalorder %s3223_s4, %s2442_s13  ;;  %p2449_p1 = scmp.lt.u32.totalorder %s2442_s13, %s3223_s4 }
  0x90   : > { %p2445_p9 = pnand %p2443_p7, %p2771_p8 }
  0x92   : > { %p2446_p4 = pneg %p2445_p9 }
  0x94   : > { %p2451_p3 = pnand %p2449_p1, %p2446_p4 }
  0x96   : > { %2454 = shalt.err (!%p2451_p3)
}
  0x97   : > { %s2455_s29 = scalar_lea.vmem %s302_s21, 512  ;;  %p2463_p13 = scmp.lt.s32.totalorder %s302_s21, %s302_s21 }
  0x98   : > { %p2456_p10 = scmp.ne.s32.totalorder %s302_s21, %s2455_s29  ;;  %p2464_p0 = scmp.lt.s32.totalorder %s2455_s29, %s2455_s29 }
  0x9a   : > { %p2458_p11 = pnand %p2456_p10, %p2771_p8  ;;  %p2465_p2 = por %p2464_p0, %p2463_p13 }
  0x9c   : > { %p2459_p12 = pneg %p2458_p11 }
  0x9e   : > { %p2466_p5 = pnand %p2465_p2, %p2459_p12 }
  0xa0   : > { %2469 = shalt.err (!%p2466_p5)
}
  0xa1   : > { %s3245_s14 = smov 8   ;;  %s3246_s20 = smov 128  }
  0xa2   : > { %2151 = dma.hbm_to_vmem [thread:$0]  (!%p2757_p6), %s3223_s4, 512, %s302_s21, [#allocation9], %s3246_s20, %s3246_s20, %s3245_s14  }
  0xa3   : > { %s2470_s3 = scalar_lea.hbm %s3225_s6, 16 }
  0xa4   : > { %p2471_p7 = scmp.ne.s32.totalorder %s3225_s6, %s2470_s3  ;;  %p2477_p1 = scmp.lt.u32.totalorder %s2470_s3, %s3225_s6 }
  0xa6   : > { %p2473_p9 = pnand %p2471_p7, %p2771_p8 }
  0xa8   : > { %p2474_p4 = pneg %p2473_p9 }
  0xaa   : > { %p2479_p3 = pnand %p2477_p1, %p2474_p4 }
  0xac   : > { %2482 = shalt.err (!%p2479_p3)
}
  0xad   : > { %s2483_s25 = scalar_lea.vmem %s329_s17, 16  ;;  %s2490_s21 = scalar_lea.vmem %s329_s17, 32 }
  0xae   : > { %p2484_p10 = scmp.ne.s32.totalorder %s329_s17, %s2483_s25  ;;  %p2491_p13 = scmp.lt.s32.totalorder %s329_s17, %s329_s17 }
  0xaf   : > { %p2492_p0 = scmp.lt.s32.totalorder %s2490_s21, %s2483_s25 }
  0xb0   : > { %p2486_p11 = pnand %p2484_p10, %p2771_p8 }
  0xb1   : > { %p2493_p2 = por %p2492_p0, %p2491_p13 }
  0xb2   : > { %p2487_p12 = pneg %p2486_p11 }
  0xb4   : > { %p2494_p5 = pnand %p2493_p2, %p2487_p12 }
  0xb6   : > { %2497 = shalt.err (!%p2494_p5)
}
  0xb7   : > { %2157 = dma.hbm_to_vmem [thread:$0]  (!%p2757_p6), %s3225_s6, 16, %s329_s17, [#allocation12]  }
  0xb8   : > { %s2651_s22 = smov [#allocation16]   ;;  %s2498_s3 = scalar_lea.hbm %s3227_s8, 16 }
  0xb9   : > { %s352_s26 = sshll.u32 %s2651_s22, 4  ;;  %p2499_p7 = scmp.ne.s32.totalorder %s3227_s8, %s2498_s3  ;;  %s353_s26 = int_to_ptr.vmem [resolvable:$true] %s352_s26 }
  0xba   : > { %p2505_p1 = scmp.lt.u32.totalorder %s2498_s3, %s3227_s8 }
  0xbb   : > { %p2501_p9 = pnand %p2499_p7, %p2771_p8 }
  0xbd   : > { %p2502_p4 = pneg %p2501_p9 }
  0xbf   : > { %p2507_p3 = pnand %p2505_p1, %p2502_p4 }
  0xc1   : > { %2510 = shalt.err (!%p2507_p3)
}
  0xc2   : > { %s2511_s17 = scalar_lea.vmem %s353_s26, 16  ;;  %s2518_s25 = scalar_lea.vmem %s353_s26, 32 }
  0xc3   : > { %p2512_p10 = scmp.ne.s32.totalorder %s353_s26, %s2511_s17  ;;  %p2519_p13 = scmp.lt.s32.totalorder %s353_s26, %s353_s26 }
  0xc4   : > { %p2520_p0 = scmp.lt.s32.totalorder %s2518_s25, %s2511_s17 }
  0xc5   : > { %p2514_p11 = pnand %p2512_p10, %p2771_p8 }
  0xc6   : > { %p2521_p2 = por %p2520_p0, %p2519_p13 }
  0xc7   : > { %p2515_p12 = pneg %p2514_p11 }
  0xc9   : > { %p2522_p5 = pnand %p2521_p2, %p2515_p12 }
  0xcb   : > { %2525 = shalt.err (!%p2522_p5)
}
  0xcc   : > { %2163 = dma.hbm_to_vmem [thread:$0]  (!%p2757_p6), %s3227_s8, 16, %s353_s26, [#allocation15]  }
  0xcd   : > { %s1845_s27 = sadd.s32 4294967294, %s2638_s12   ;;  %s2931_s19 = sadd.s32 1, %s2638_s12  }
  0xce   : > { %s33_s29 = ssub.s32 %s2638_s12, %s2931_s19  ;;  %s36_s22 = sadd.s32 1, %s2634_s11 }
  0xcf   : > { %p34_p8 = scmp.eq.s32.totalorder %s33_s29, 0  ;;  %p43_p7 = scmp.ne.s32.totalorder %s2634_s11, %s2630_s10 }
  0xd0   : > { %p44_p9 = scmp.eq.s32.totalorder %s2638_s12, 0  ;;  %p49_p4 = scmp.ne.s32.totalorder %s2630_s10, %s2626_s30 }
  0xd1   : > { %s2942_s18 = scalar_select %p34_p8, %s2634_s11, %s36_s22  }
  0xd2   : > { %p2944_p1 = por %p44_p9, %p43_p7  ;;  %p3248_p3 = scmp.eq.s32.totalorder %s2741_s15, 0 }
  0xd3   : > { %p241_p10 = scmp.eq.s32.totalorder %s2741_s15, 1  ;;  %p247_p11 = scmp.eq.s32.totalorder %s1845_s27, 1 }
  0xd4   : > { %p2950_p6 = por %p3248_p3, %p49_p4  ;;  %p2180_p12 = scmp.lt.s32.totalorder %s2638_s12, 2 }
  0xd5   : > { %s363_s3 = sand.u32 1, %s2634_s11   ;;  %p2957_p13 = por %p241_p10, %p43_p7 }
  0xd6   : > { %p2961_p0 = por %p247_p11, %p49_p4  ;;  %s1856_s23 = sshll.u32 %s363_s3, 4 }
  0xd7   : > { %s3250_s9 = scalar_select %p2957_p13, 1, 0 }
  0xd8   : > { %s3251_s13 = scalar_select %p2961_p0, 1, 0 }
  0xd9   : > { %s1898_s24 = sshll.u32 %s2638_s12, 8  ;;  %s367_s28 = scalar_lea.vmem [#allocation2], %s1856_s23 }
  0xda   : > { %s2969_s21 = scalar_lea.hbm %s3219_s0, %s1898_s24  ;;  %s374_s27 = sshll.u32 %s367_s28, 4  ;;  %s2971_s27 = int_to_ptr.vmem [resolvable:$true] %s374_s27 }
  0xdb   : > { %p2975_p2 = pnand %p2180_p12, %p2944_p1  ;;  %s2979_s22 = scalar_lea.sflag [#allocation3], %s363_s3 }
  0xdc   : > { %s2526_s17 = scalar_lea.hbm %s2969_s21, 256  ;;  %s2531_s1 = scalar_lea.hbm %s3219_s0, 512 }
  0xdd   : > { %p2527_p5 = scmp.ne.s32.totalorder %s2969_s21, %s2526_s17  ;;  %p2528_p8 = pneg %p2975_p2 }
  0xde   : > { %p2532_p4 = scmp.lt.u32.totalorder %s2969_s21, %s3219_s0  ;;  %p2533_p1 = scmp.lt.u32.totalorder %s2531_s1, %s2526_s17 }
  0xdf   : > { %p2529_p7 = pnand %p2528_p8, %p2527_p5  ;;  %p2535_p10 = scmp.lt.u32.totalorder %s2526_s17, %s2969_s21 }
  0xe0   : > { %p2534_p3 = por %p2533_p1, %p2532_p4 }
  0xe1   : > { %p2530_p9 = pneg %p2529_p7 }
  0xe2   : > { %p2536_p11 = por %p2535_p10, %p2534_p3 }
  0xe4   : > { %p2537_p12 = pnand %p2536_p11, %p2530_p9 }
  0xe6   : > { %2540 = shalt.err (!%p2537_p12)
}
  0xe7   : > { %s2541_s3 = scalar_lea.vmem %s2971_s27, 256  ;;  %s2652_s23 = smov [#allocation2]  }
  0xe8   : > { %p2542_p5 = scmp.ne.s32.totalorder %s2971_s27, %s2541_s3  ;;  %s2546_s24 = sshll.u32 %s2652_s23, 4  ;;  %s2547_s24 = int_to_ptr.vmem [resolvable:$false] %s2546_s24 }
  0xe9   : > { %s2548_s25 = scalar_lea.vmem %s2547_s24, 512  ;;  %p2549_p13 = scmp.lt.s32.totalorder %s2971_s27, %s2547_s24 }
  0xea   : > { %p2544_p7 = pnand %p2542_p5, %p2528_p8  ;;  %p2550_p4 = scmp.lt.s32.totalorder %s2548_s25, %s2541_s3 }
  0xec   : > { %p2545_p0 = pneg %p2544_p7  ;;  %p2551_p1 = por %p2550_p4, %p2549_p13 }
  0xee   : > { %p2552_p3 = pnand %p2551_p1, %p2545_p0 }
  0xf0   : > { %2555 = shalt.err (!%p2552_p3)
}
  0xf1   : > { %2167 = dma.hbm_to_vmem [thread:$0]  (!%p2975_p2), %s2969_s21, 256, %s2971_s27, %s2979_s22, %s3246_s20, %s3246_s20, %s3245_s14  }
  0xf2   : > { %p3253_p8 = scmp.ne.s32.totalorder %s3240_s16, 0 }
  0xf3   : > { %s3013_s17 = sand.u32 (!%p3253_p8), 1, %s2630_s10  }
  0xf4   : > { %386 = sbr.rel (%p3253_p8) target bundleno = 3564 (0xdec), region = 56  ;;  %s1860_s1 = sshll.u32 (!%p3253_p8), %s3013_s17, 4 }
  0xf5   : > { %s389_s28 = scalar_lea.sflag (!%p3253_p8), [#allocation3], %s3013_s17  ;;  %s392_s29 = scalar_lea.vmem (!%p3253_p8), [#allocation2], %s1860_s1 }
  0xfb   : > { %2601 = dma.done.wait (%p2950_p6), %s389_s28, 256  }
  0xfc   : > { %2603 = vsyncadd (%p2950_p6), %s389_s28, 4294967040  ;;  %p3254_p13 = scmp.eq.s32.totalorder %s2741_s15, 0 }
  0xfe   : > { %2605 = dma.done.wait (%p3254_p13), [#allocation6], 48   ;;  %p3255_p0 = pmov %p3254_p13 }
 0x100   : > { %2607 = vsyncadd (%p3255_p0), [#allocation6], 4294967248  ;;  %p3256_p2 = pmov %p3255_p0 }
 0x101   : > { %p3257_p9 = pmov %p3255_p0 }
 0x102   : > { %2609 = dma.done.wait (%p3256_p2), [#allocation9], 1024  }
 0x103   : > { %2611 = vsyncadd (%p3257_p9), [#allocation9], 4294966272  ;;  %p3258_p10 = pmov %p3255_p0 }
 0x104   : > { %p3259_p11 = pmov %p3255_p0 }
 0x105   : > { %2613 = dma.done.wait (%p3258_p10), [#allocation12], 272  }
 0x106   : > { %2615 = vsyncadd (%p3259_p11), [#allocation12], 4294967024  ;;  %p3260_p6 = pmov %p3255_p0 }
 0x107   : > { %p3261_p12 = pmov %p3255_p0 }
 0x108   : > { %2617 = dma.done.wait (%p3260_p6), [#allocation15], 272  }
 0x109   : > { %2619 = vsyncadd (%p3261_p12), [#allocation15], 4294967024  ;;  %v2653_v0 = vmov 0.0   ;;  %vm2654_vm0 = vmmov 0   ;;  %vm475_vm1 = vcmask 1041408   ;;  %v460_v2 = vld [vmem:[%s392_s29] sm:$0xff]  ;;  %v696_v38 = vlaneseq }
 0x10a   : > { %1949 = vmatprep.subr.bf16.mxu0 %v2653_v0  ;;  %1951 = vmatprep.mubr.msk.bf16.mxu0 %vm2654_vm0, %v2653_v0  ;;  %v463_v1 = vld [vmem:[#allocation5] sm:$0x3]  ;;  %v461_v3 = vld [vmem:[%s392_s29 + $0x8] sm:$0xff]  ;;  %vm471_vm2 = vcmask 31744   ;;  %v2655_v9 = vmov 0.0|0.0   ;;  %vm538_vm3 = vcmask 261120  }
 0x10b   : > { %1963 = vmatprep.mubr.msk.f32.mxu1 %vm2654_vm0, %v2653_v0  ;;  %v477_v4 = vsel %vm475_vm1, %v463_v1, 0  ;;  %v462_v5 = vpack.c.bf16 %v461_v3, %v460_v2  ;;  %v520_v6 = vld [vmem:[#allocation8] sm:$0xff]  ;;  %v521_v7 = vld [vmem:[#allocation8 + $0x8] sm:$0xff]  ;;  %2079 = vmatprep.subr.bf16.mxu1 %v2655_v9  ;;  %v522_v10 = vld [vmem:[#allocation8 + $0x10] sm:$0xff]  ;;  %v697_v39 = vshrl.u32 %v696_v38, 7  ;;  %s2656_s16 = smov 120  }
 0x10c   : > { %1950 = vmatpush3.bf16.msra.mxu0 %v477_v4  ;;  %v2080_v8 = vpack.c.bf16 %v521_v7, %v520_v6  ;;  %v523_v11 = vld [vmem:[#allocation8 + $0x18] sm:$0xff]  ;;  %v524_v13 = vld [vmem:[#allocation10] sm:$0xff]  ;;  %v525_v14 = vld [vmem:[#allocation10 + $0x8] sm:$0xff]  ;;  %s2657_s14 = smov 96   ;;  %s2658_s20 = smov 88   ;;  %vm935_vm4 = vcmask 64512  }
 0x10d   : > { %2085 = vmatprep.subr.bf16.mxu0 %v2655_v9  ;;  %v2083_v12 = vpack.c.bf16 %v523_v11, %v522_v10  ;;  %v2086_v15 = vpack.c.bf16 %v525_v14, %v524_v13  ;;  %v1870_v16 = vld [vmem:[#allocation7] ss:$0 sm:$0xff]  ;;  %v526_v32 = vld [vmem:[#allocation10 + $0x10] sm:$0xff]  ;;  %v698_v40 = vsub.s32 0, %v697_v39  ;;  %v2250_v62 = vld [vmem:[#allocation11] sm:$0xff]   ;;  %vm985_vm5 = vcmask 130048  }
 0x10e   : > { %2081 = vmatpush3.bf16.msra.mxu1 %v2080_v8  ;;  %v527_v33 = vld [vmem:[#allocation10 + $0x18] sm:$0xff]  ;;  %v2251_v63 = vld [vmem:[#allocation11 + $0x8] sm:$0xff]   ;;  %v1876_v7 = vld [vmem:[#allocation13] ss:$0 sm:$0xff]  ;;  %s2659_s26 = smov 56   ;;  %s2660_s21 = smov 64  }
 0x10f   : > { %1952 = vmatmul.mubr.msk.bf16.vlgmr.msra.gmra.mrb[0].mxu0 %vm471_vm2, %v462_v5  ;;  %2082 = vmatprep.subr.bf16.mxu1 %v2655_v9  ;;  %v2089_v34 = vpack.c.bf16 %v527_v33, %v526_v32  ;;  %s2661_s27 = smov 112   ;;  %s2662_s22 = smov 80   ;;  %vm1208_vm6 = vcmask 1043456  }
 0x110   : > { %1974 = vmatprep.mubr.msk.f32.mxu0 %vm2654_vm0, %v2653_v0  ;;  %2087 = vmatpush3.bf16.msra.mxu0 %v2086_v15  ;;  %s2663_s3 = smov 72   ;;  %s2664_s23 = smov 48  }
 0x111   : > { %2088 = vmatprep.subr.bf16.mxu0 %v2655_v9  ;;  %s2665_s24 = smov 104   ;;  %s2666_s25 = smov 40  }
 0x112   : > { %2084 = vmatpush3.bf16.msra.mxu1 %v2083_v12  ;;  %s1899_s28 = sshll.u32 %s2741_s15, 8  ;;  %s458_s29 = scalar_lea.vmem [#allocation17], %s1860_s1 }
 0x113   : > { %2091 = vmatprep.subr.bf16.mxu1 %v2655_v9  ;;  %s1683_s15 = scalar_lea.sflag [#allocation4], %s3013_s17  ;;  %p3263_p7 = scmp.ne.s32.totalorder %s3250_s9, 0 }
 0x114   : > { %2090 = vmatpush3.bf16.msra.mxu0 %v2089_v34 }
 0x115   : > { %2097 = vmatprep.subr.bf16.mxu0 %v2655_v9 }
 0x1e2   : > { %v513_v17 = vpop.f32.mrb[0].mxu0 }
 0x1e3   : > { %v3046_v18 = vadd.f32 %v1870_v16, %v513_v17  ;;  %v1953_v19 = vpop.f32.mrb[1].mxu0 }
 0x1e4   : > { %v516_v20 = vpop.f32.mrb[2].mxu0 }
 0x1e5   : > { %v3048_v21 = vadd.f32 %v1870_v16, %v516_v20  ;;  %v1954_v22 = vpop.f32.mrb[3].mxu0  ;;  %v539_v23 = vsel %vm538_vm3, %v3046_v18, 0.0 }
 0x1e7   : > { %v540_v24 = vsel %vm538_vm3, %v3048_v21, 0.0 }
 0x1e8   : > { %v541_v25 = vadd.f32 %v540_v24, %v539_v23 }
 0x1ea   : > { %v542_v26 = vrot.slane %v541_v25, 4 }
 0x1ec   : > { %v543_v27 = vadd.f32 %v542_v26, %v541_v25 }
 0x1ee   : > { %v544_v28 = vrot.slane %v543_v27, 2 }
 0x1f0   : > { %v545_v29 = vadd.f32 %v544_v28, %v543_v27 }
 0x1f2   : > { %v546_v30 = vrot.slane %v545_v29, 1 }
 0x1f4   : > { %v547_v31 = vadd.f32 %v546_v30, %v545_v29 }
 0x1f6   : > { %1964 = vmatmul.mubr.msk.f32.vlgmr.msra.gmra.mrb[0].mxu1 %vm538_vm3, %v547_v31 }
 0x1f7   : > { %2093 = vmatpush3.bf16.msra.mxu1 %v2080_v8  ;;  %1985 = vmatprep.mubr.msk.f32.mxu1 %vm2654_vm0, %v2653_v0 }
 0x1f8   : > { %2094 = vmatprep.subr.bf16.mxu1 %v2655_v9 }
 0x1fb   : > { %2096 = vmatpush3.bf16.msra.mxu1 %v2083_v12 }
 0x1fc   : > { %1999 = vmatprep.subr.bf16.mxu1 %v2653_v0 }
 0x2c9   : > { %v617_v35 = vpop.f32.mrb[0].mxu1 }
 0x2ca   : > { %v622_v36 = vmul.f32 0.0625, %v617_v35  ;;  %v1965_v37 = vpop.f32.mrb[1].mxu1 }
 0x2cc   : > { %1975 = vmatmul.mubr.msk.f32.vlgmr.msra.gmra.mrb[4].mxu0 %vm538_vm3, %v622_v36 }
 0x2cd   : > { %2099 = vmatpush3.bf16.msra.mxu0 %v2086_v15  ;;  %1996 = vmatprep.mubr.msk.f32.mxu0 %vm2654_vm0, %v2653_v0 }
 0x2ce   : > { %2100 = vmatprep.subr.bf16.mxu0 %v2655_v9 }
 0x2d1   : > { %2102 = vmatpush3.bf16.msra.mxu0 %v2089_v34 }
 0x2d2   : > { %2007 = vmatprep.subr.bf16.mxu0 %v2653_v0 }
 0x39f   : > { %v692_v41 = vpop.f32.mrb[4].mxu0 }
 0x3a0   : > { %v699_v42 = vrot.slane %v692_v41, %v698_v40  ;;  %v1976_v43 = vpop.f32.mrb[5].mxu0 }
 0x3a2   : > { %v700_v44 = vsub.f32 %v3046_v18, %v699_v42  ;;  %v701_v45 = vsub.f32 %v3048_v21, %v699_v42 }
 0x3a4   : > { %v702_v46 = vmul.f32 %v700_v44, %v700_v44  ;;  %v703_v47 = vmul.f32 %v701_v45, %v701_v45 }
 0x3a6   : > { %v704_v48 = vsel %vm538_vm3, %v702_v46, 0.0  ;;  %v705_v49 = vsel %vm538_vm3, %v703_v47, 0.0 }
 0x3a7   : > { %v706_v50 = vadd.f32 %v705_v49, %v704_v48 }
 0x3a9   : > { %v707_v51 = vrot.slane %v706_v50, 4 }
 0x3ab   : > { %v708_v52 = vadd.f32 %v707_v51, %v706_v50 }
 0x3ad   : > { %v709_v53 = vrot.slane %v708_v52, 2 }
 0x3af   : > { %v710_v54 = vadd.f32 %v709_v53, %v708_v52 }
 0x3b1   : > { %v711_v55 = vrot.slane %v710_v54, 1 }
 0x3b3   : > { %v712_v56 = vadd.f32 %v711_v55, %v710_v54 }
 0x3b5   : > { %1986 = vmatmul.mubr.msk.f32.vlgmr.msra.gmra.mrb[2].mxu1 %vm538_vm3, %v712_v56 }
 0x3b6   : > { %2003 = vmatprep.mubr.msk.bf16.mxu1 %vm2654_vm0, %v2653_v0  ;;  %2000 = vmatpush3.bf16.msra.mxu1 %v2250_v62  ;;  %v533_v62 = vld [vmem:[#allocation14] sm:$0xf] }
 0x3b7   : > { %2001 = vmatprep.subr.bf16.mxu1 %v2653_v0 }
 0x3ba   : > { %2002 = vmatpush3.bf16.msra.mxu1 %v2251_v63  ;;  %v1257_v63 = vsel %vm1208_vm6, %v533_v62, 0 }
 0x3bb   : > { %2013 = vmatprep.subr.bf16.mxu1 %v2653_v0 }
 0x488   : > { %v782_v57 = vpop.f32.mrb[2].mxu1 }
 0x489   : > { %v786_v58 = vmul.f32 0.0625, %v782_v57  ;;  %v1987_v59 = vpop.f32.mrb[3].mxu1 }
 0x48b   : > { %v787_v60 = vadd.f32 1e-05, %v786_v58 }
 0x48d   : > { %2252 = vrsqrt.f32 %v787_v60 }
 0x497   : > { %v2253_v61 = vpop.eup %2252 }
 0x498   : > { %1997 = vmatmul.mubr.msk.f32.vlgmr.msra.gmra.mrb[6].mxu0 %vm538_vm3, %v2253_v61 }
 0x499   : > { %2009 = vmatprep.mubr.msk.bf16.mxu0 %vm2654_vm0, %v2653_v0 }
 0x56b   : > { %v858_v1 = vpop.f32.mrb[6].mxu0 }
 0x56c   : > { %v865_v2 = vrot.slane %v858_v1, %v698_v40  ;;  %v1998_v3 = vpop.f32.mrb[7].mxu0  ;;  %v534_v1 = vld [vmem:[#allocation14 + $0x4] sm:$0xf] }
 0x56e   : > { %v866_v4 = vmul.f32 %v865_v2, %v700_v44  ;;  %v867_v5 = vmul.f32 %v865_v2, %v701_v45  ;;  %v1210_v2 = vsel %vm1208_vm6, %v534_v1, 0 }
 0x570   : > { %v868_v6 = vpack.c.bf16 %v867_v5, %v866_v4 }
 0x572   : > { %2004 = vmatmul.mubr.msk.bf16.vlgmr.msra.gmra.mrb[4].mxu1 %vm538_vm3, %v868_v6 }
 0x573   : > { %2015 = vmatprep.mubr.msk.bf16.mxu1 %vm2654_vm0, %v2653_v0 }
 0x645   : > { %v924_v8 = vpop.f32.mrb[4].mxu1 }
 0x646   : > { %v2005_v9 = vpop.f32.mrb[5].mxu1  ;;  %v925_v11 = vadd.f32 %v1876_v7, %v924_v8 }
 0x647   : > { %v927_v10 = vpop.f32.mrb[6].mxu1 }
 0x648   : > { %v928_v12 = vadd.f32 %v1876_v7, %v927_v10  ;;  %v2006_v13 = vpop.f32.mrb[7].mxu1 }
 0x64a   : > { %v3077_v14 = vpack.c.bf16 %v928_v12, %v925_v11 }
 0x64c   : > { %1069 = vrot.lane.b32.xlu1 %v3077_v14, %s2656_s16  ;;  %933 = vrot.lane.b32.xlu0 %v3077_v14, %s2657_s14  ;;  %s1696_s16 = sshll.u32 %s458_s29, 4  ;;  %s3173_s16 = int_to_ptr.vmem [resolvable:$true] %s1696_s16 }
 0x64d   : > { %s2556_s1 = scalar_lea.vmem %s3173_s16, 256 }
 0x64e   : > { %p2557_p5 = scmp.ne.s32.totalorder %s3173_s16, %s2556_s1 }
 0x650   : > { %1071 = vrot.lane.b32.xlu0 %v3077_v14, %s2658_s20  ;;  %p2558_p4 = pnand %p2557_p5, %p3263_p7 }
 0x652   : > { %p2559_p1 = pneg %p2558_p4 }
 0x6be   : > { %v934_v15 = vpop.permute.xlu0 %933  ;;  %v1070_v20 = vpop.permute.xlu1 %1069 }
 0x6bf   : > { %v940_v16 = vsel %vm935_vm4, %v934_v15, 0 }
 0x6c0   : > { %2008 = vmatpush3.bf16.xpose.msra.mxu0 %v940_v16 }
 0x6c1   : > { %2019 = vmatprep.subr.bf16.mxu0 %v2653_v0 }
 0x6c2   : > { %v1072_v17 = vpop.permute.xlu0 %1071 }
 0x6c3   : > { %v1077_v19 = vsel %vm935_vm4, %v1072_v17, 0 }
 0x6c7   : > { %2010 = vmatmul.mubr.msk.bf16.vlgmr.msra.gmra.mrb[8].mxu0 %vm935_vm4, %v3077_v14 }
 0x6c8   : > { %2020 = vmatpush3.bf16.xpose.msra.mxu0 %v1077_v19  ;;  %2021 = vmatprep.mubr.msk.bf16.mxu0 %vm2654_vm0, %v2653_v0 }
 0x6c9   : > { %2031 = vmatprep.subr.bf16.mxu0 %v2653_v0 }
 0x6cf   : > { %2022 = vmatmul.mubr.msk.bf16.vlgmr.msra.gmra.mrb[12].mxu0 %vm935_vm4, %v1070_v20 }
 0x6d0   : > { %2033 = vmatprep.mubr.msk.bf16.mxu0 %vm2654_vm0, %v2653_v0  ;;  %2032 = vmatpush3.bf16.msra.mxu0 %v1210_v2 }
 0x6d1   : > { %2043 = vmatprep.subr.bf16.mxu0 %v2653_v0 }
 0x79a   : > { %v976_v22 = vpop.f32.mrb[8].mxu0 }
 0x79b   : > { %v983_v23 = vmul.f32 0.35355338, %v976_v22  ;;  %v2011_v24 = vpop.f32.mrb[9].mxu0 }
 0x79c   : > { %v979_v25 = vpop.f32.mrb[10].mxu0 }
 0x79d   : > { %v984_v26 = vmul.f32 0.35355338, %v979_v25  ;;  %v2012_v27 = vpop.f32.mrb[11].mxu0  ;;  %v986_v28 = vsel %vm985_vm5, %v983_v23, -inf }
 0x79e   : > { %987 = vmax.xlane.f32.xlu1 %v986_v28 }
 0x79f   : > { %v989_v29 = vsel %vm985_vm5, %v984_v26, -inf }
 0x7a0   : > { %990 = vmax.xlane.f32.xlu0 %v989_v29 }
 0x7a2   : > { %v1113_v30 = vpop.f32.mrb[12].mxu0 }
 0x7a3   : > { %v1120_v31 = vmul.f32 0.35355338, %v1113_v30  ;;  %v2023_v32 = vpop.f32.mrb[13].mxu0 }
 0x7a4   : > { %v1116_v33 = vpop.f32.mrb[14].mxu0 }
 0x7a5   : > { %v1121_v34 = vmul.f32 0.35355338, %v1116_v33  ;;  %v2024_v35 = vpop.f32.mrb[15].mxu0  ;;  %v1122_v36 = vsel %vm985_vm5, %v1120_v31, -inf }
 0x7a6   : > { %1123 = vmax.xlane.f32.xlu0 %v1122_v36 }
 0x7a7   : > { %v1125_v37 = vsel %vm985_vm5, %v1121_v34, -inf }
 0x7a8   : > { %1126 = vmax.xlane.f32.xlu1 %v1125_v37 }
 0x7b9   : > { %1151 = vrot.lane.b32.xlu1 %v3077_v14, %s2659_s26  ;;  %s3262_s26 = sld [smem:[#allocation26_spill]] }
 0x7bc   : > { %1015 = vrot.lane.b32.xlu0 %v3077_v14, %s2660_s21 }
 0x7bf   : > { %s3171_s21 = scalar_lea.hbm %s3262_s26, %s1899_s28 }
 0x82b   : > { %v988_v38 = vpop.xlane.xlu1 %987 }
 0x82c   : > { %v998_v39 = vsub.f32 %v983_v23, %v988_v38  ;;  %v992_v3 = vsub.f32 -inf, %v988_v38 }
 0x82d   : > { %v991_v40 = vpop.xlane.xlu0 %990 }
 0x82e   : > { %v1000_v41 = vmul.f32 1.442695, %v998_v39  ;;  %v999_v42 = vsub.f32 %v984_v26, %v991_v40  ;;  %v993_v4 = vsub.f32 -inf, %v991_v40  ;;  %v994_v5 = vmul.f32 1.442695, %v992_v3 }
 0x830   : > { %v1002_v43 = vmul.f32 1.442695, %v999_v42  ;;  %2254 = vpow2.f32 %v1000_v41  ;;  %v996_v6 = vmul.f32 1.442695, %v993_v4 }
 0x832   : > { %2256 = vpow2.f32 %v1002_v43 }
 0x833   : > { %v1124_v44 = vpop.xlane.xlu0 %1123 }
 0x834   : > { %v1134_v45 = vsub.f32 %v1120_v31, %v1124_v44  ;;  %v1128_v7 = vsub.f32 -inf, %v1124_v44 }
 0x835   : > { %v1127_v46 = vpop.xlane.xlu1 %1126 }
 0x836   : > { %v1136_v47 = vmul.f32 1.442695, %v1134_v45  ;;  %v1135_v48 = vsub.f32 %v1121_v34, %v1127_v46  ;;  %v1129_v8 = vsub.f32 -inf, %v1127_v46  ;;  %v1130_v9 = vmul.f32 1.442695, %v1128_v7 }
 0x837   : > { %v1016_v49 = vpop.permute.xlu0 %1015 }
 0x838   : > { %v1138_v50 = vmul.f32 1.442695, %v1135_v48  ;;  %2014 = vmatpush3.bf16.msra.mxu1 %v1016_v49  ;;  %2258 = vpow2.f32 %v1136_v47  ;;  %v1132_v11 = vmul.f32 1.442695, %v1129_v8 }
 0x839   : > { %2025 = vmatprep.subr.bf16.mxu1 %v2653_v0  ;;  %v1152_v54 = vpop.permute.xlu1 %1151 }
 0x83a   : > { %2260 = vpow2.f32 %v1138_v50  ;;  %v2255_v51 = vpop.eup %2254 }
 0x83b   : > { %v1006_v60 = vsel %vm985_vm5, %v2255_v51, 0.0  ;;  %2262 = vpow2.f32 %v994_v5 }
 0x83c   : > { %v2257_v52 = vpop.eup %2256  ;;  %2264 = vpow2.f32 %v996_v6 }
 0x83d   : > { %v1014_v53 = vpack.c.bf16 %v2257_v52, %v2255_v51  ;;  %v1009_v61 = vsel %vm985_vm5, %v2257_v52, 0.0  ;;  %2266 = vpow2.f32 %v1130_v9 }
 0x83e   : > { %2268 = vpow2.f32 %v1132_v11 }
 0x83f   : > { %2016 = vmatmul.mubr.msk.bf16.vlgmr.msra.gmra.mrb[8].mxu1 %vm985_vm5, %v1014_v53 }
 0x840   : > { %2026 = vmatpush3.bf16.msra.mxu1 %v1152_v54  ;;  %2027 = vmatprep.mubr.msk.bf16.mxu1 %vm2654_vm0, %v2653_v0 }
 0x841   : > { %2037 = vmatprep.subr.bf16.mxu1 %v2653_v0 }
 0x842   : > { %v2259_v55 = vpop.eup %2258 }
 0x843   : > { %v1142_v56 = vsel %vm985_vm5, %v2259_v55, 0.0 }
 0x844   : > { %v2261_v57 = vpop.eup %2260  ;;  %1143 = vadd.xlane.f32.xlu1 %v1142_v56 }
 0x845   : > { %v1145_v58 = vsel %vm985_vm5, %v2261_v57, 0.0  ;;  %v1150_v59 = vpack.c.bf16 %v2261_v57, %v2259_v55  ;;  %v2263_v13 = vpop.eup %2262 }
 0x846   : > { %1146 = vadd.xlane.f32.xlu0 %v1145_v58  ;;  %v2265_v16 = vpop.eup %2264  ;;  %v1004_v19 = vmul.f32 0.0, %v2263_v13 }
 0x847   : > { %2028 = vmatmul.mubr.msk.bf16.vlgmr.msra.gmra.mrb[12].mxu1 %vm985_vm5, %v1150_v59  ;;  %v1005_v23 = vmul.f32 0.0, %v2265_v16  ;;  %v2267_v25 = vpop.eup %2266 }
 0x848   : > { %2039 = vmatprep.mubr.msk.bf16.mxu1 %vm2654_vm0, %v2653_v0  ;;  %2038 = vmatpush3.bf16.msra.mxu1 %v1257_v63  ;;  %v2269_v27 = vpop.eup %2268  ;;  %v1140_v28 = vmul.f32 0.0, %v2267_v25 }
 0x849   : > { %2049 = vmatprep.subr.bf16.mxu1 %v2653_v0  ;;  %v1141_v30 = vmul.f32 0.0, %v2269_v27 }
 0x855   : > { %1300 = vrot.lane.b32.xlu1 %v3077_v14, %s2661_s27  ;;  %s2667_s27 = smov [#allocation17]  }
 0x85c   : > { %1302 = vrot.lane.b32.xlu0 %v3077_v14, %s2662_s22  ;;  %s2560_s22 = sshll.u32 %s2667_s27, 4  ;;  %s2561_s22 = int_to_ptr.vmem [resolvable:$false] %s2560_s22 }
 0x85d   : > { %p2563_p3 = scmp.lt.s32.totalorder %s3173_s16, %s2561_s22 }
 0x879   : > { %1007 = vadd.xlane.f32.xlu1 %v1006_v60 }
 0x87b   : > { %1010 = vadd.xlane.f32.xlu0 %v1009_v61 }
 0x8d1   : > { %v1144_v10 = vpop.xlane.xlu1 %1143 }
 0x8d2   : > { %v1148_v29 = vadd.f32 %v1144_v10, %v1140_v28 }
 0x8d3   : > { %v1147_v12 = vpop.xlane.xlu0 %1146 }
 0x8d4   : > { %v1149_v31 = vadd.f32 %v1147_v12, %v1141_v30 }
 0x8d5   : > { %v1301_v15 = vpop.permute.xlu1 %1300 }
 0x8d7   : > { %v1303_v17 = vpop.permute.xlu0 %1302 }
 0x8d8   : > { %v1308_v54 = vsel %vm935_vm4, %v1303_v17, 0 }
 0x906   : > { %v1008_v20 = vpop.xlane.xlu1 %1007 }
 0x907   : > { %v1012_v22 = vadd.f32 %v1008_v20, %v1004_v19 }
 0x908   : > { %v1011_v24 = vpop.xlane.xlu0 %1010 }
 0x909   : > { %2270 = vrcp.f32 %v1012_v22  ;;  %v1013_v26 = vadd.f32 %v1011_v24, %v1005_v23 }
 0x90b   : > { %2272 = vrcp.f32 %v1013_v26 }
 0x90c   : > { %2274 = vrcp.f32 %v1148_v29 }
 0x90d   : > { %2276 = vrcp.f32 %v1149_v31 }
 0x912   : > { %v1055_v32 = vpop.f32.mrb[8].mxu1 }
 0x913   : > { %v2271_v33 = vpop.eup %2270  ;;  %v1062_v34 = vadd.f32 %v1055_v32, %v1004_v19  ;;  %v2017_v35 = vpop.f32.mrb[9].mxu1 }
 0x914   : > { %v1058_v36 = vpop.f32.mrb[10].mxu1 }
 0x915   : > { %v2273_v37 = vpop.eup %2272  ;;  %v1066_v38 = vmul.f32 %v2271_v33, %v1062_v34  ;;  %v1063_v39 = vadd.f32 %v1058_v36, %v1005_v23  ;;  %v2018_v40 = vpop.f32.mrb[11].mxu1 }
 0x916   : > { %v2275_v46 = vpop.eup %2274 }
 0x917   : > { %v1067_v41 = vmul.f32 %v2273_v37, %v1063_v39  ;;  %v2277_v51 = vpop.eup %2276 }
 0x919   : > { %v1068_v42 = vpack.c.bf16 %v1067_v41, %v1066_v38 }
 0x91a   : > { %v1191_v43 = vpop.f32.mrb[12].mxu1 }
 0x91b   : > { %v1198_v44 = vadd.f32 %v1191_v43, %v1140_v28  ;;  %v2029_v45 = vpop.f32.mrb[13].mxu1  ;;  %2040 = vmatmul.mubr.msk.bf16.vlgmr.msra.gmra.mrb[16].mxu1 %vm935_vm4, %v1068_v42  ;;  %v535_v28 = vld [vmem:[#allocation14 + $0x8] sm:$0xf] }
 0x91c   : > { %v1194_v47 = vpop.f32.mrb[14].mxu1  ;;  %2051 = vmatprep.mubr.msk.bf16.mxu1 %vm2654_vm0, %v2653_v0  ;;  %v1440_v29 = vsel %vm1208_vm6, %v535_v28, 0 }
 0x91d   : > { %v1202_v48 = vmul.f32 %v2275_v46, %v1198_v44  ;;  %v1199_v49 = vadd.f32 %v1194_v47, %v1141_v30  ;;  %v2030_v50 = vpop.f32.mrb[15].mxu1 }
 0x91f   : > { %v1203_v52 = vmul.f32 %v2277_v51, %v1199_v49 }
 0x921   : > { %v1204_v53 = vpack.c.bf16 %v1203_v52, %v1202_v48 }
 0x923   : > { %2034 = vmatmul.mubr.msk.bf16.vlgmr.msra.gmra.mrb[16].mxu0 %vm935_vm4, %v1204_v53 }
 0x924   : > { %2044 = vmatpush3.bf16.xpose.msra.mxu0 %v1308_v54  ;;  %2045 = vmatprep.mubr.msk.bf16.mxu0 %vm2654_vm0, %v2653_v0 }
 0x925   : > { %2055 = vmatprep.subr.bf16.mxu0 %v2653_v0 }
 0x92b   : > { %2046 = vmatmul.mubr.msk.bf16.vlgmr.msra.gmra.mrb[20].mxu0 %vm935_vm4, %v1301_v15 }
 0x92c   : > { %2057 = vmatprep.mubr.msk.bf16.mxu0 %vm2654_vm0, %v2653_v0  ;;  %2056 = vmatpush3.bf16.msra.mxu0 %v1440_v29 }
 0x92d   : > { %2067 = vmatprep.subr.bf16.mxu0 %v2653_v0 }
 0x9ee   : > { %v1293_v55 = vpop.f32.mrb[16].mxu1 }
 0x9ef   : > { %v2041_v56 = vpop.f32.mrb[17].mxu1 }
 0x9f0   : > { %v1296_v57 = vpop.f32.mrb[18].mxu1 }
 0x9f1   : > { %v2042_v58 = vpop.f32.mrb[19].mxu1 }
 0x9f6   : > { %v1246_v59 = vpop.f32.mrb[16].mxu0 }
 0x9f7   : > { %v3128_v60 = vadd.f32 %v1293_v55, %v1246_v59  ;;  %v2035_v61 = vpop.f32.mrb[17].mxu0 }
 0x9f8   : > { %v1249_v62 = vpop.f32.mrb[18].mxu0 }
 0x9f9   : > { %v3130_v63 = vadd.f32 %v1296_v57, %v1249_v62  ;;  %v2036_v1 = vpop.f32.mrb[19].mxu0 }
 0x9fe   : > { %v1344_v2 = vpop.f32.mrb[20].mxu0 }
 0x9ff   : > { %v1351_v3 = vmul.f32 0.35355338, %v1344_v2  ;;  %v2047_v4 = vpop.f32.mrb[21].mxu0 }
 0xa00   : > { %v1347_v5 = vpop.f32.mrb[22].mxu0 }
 0xa01   : > { %v1352_v6 = vmul.f32 0.35355338, %v1347_v5  ;;  %v2048_v7 = vpop.f32.mrb[23].mxu0  ;;  %v1353_v8 = vsel %vm985_vm5, %v1351_v3, -inf }
 0xa02   : > { %1354 = vmax.xlane.f32.xlu0 %v1353_v8 }
 0xa03   : > { %v1356_v9 = vsel %vm985_vm5, %v1352_v6, -inf }
 0xa04   : > { %1357 = vmax.xlane.f32.xlu1 %v1356_v9 }
 0xa15   : > { %1487 = vrot.lane.b32.xlu1 %v3077_v14, %s2663_s3  ;;  %s2562_s3 = scalar_lea.vmem %s2561_s22, 512 }
 0xa16   : > { %p2564_p8 = scmp.lt.s32.totalorder %s2562_s3, %s2556_s1 }
 0xa18   : > { %1382 = vrot.lane.b32.xlu0 %v3077_v14, %s2664_s23  ;;  %p2565_p13 = por %p2564_p8, %p2563_p3 }
 0xa19   : > { %1485 = vrot.lane.b32.xlu1 %v3077_v14, %s2665_s24 }
 0xa1a   : > { %p2566_p0 = pnand %p2565_p13, %p2559_p1 }
 0xa8f   : > { %v1355_v10 = vpop.xlane.xlu0 %1354 }
 0xa90   : > { %v1365_v11 = vsub.f32 %v1351_v3, %v1355_v10  ;;  %v1359_v30 = vsub.f32 -inf, %v1355_v10 }
 0xa91   : > { %v1358_v12 = vpop.xlane.xlu1 %1357 }
 0xa92   : > { %v1367_v13 = vmul.f32 1.442695, %v1365_v11  ;;  %v1366_v15 = vsub.f32 %v1352_v6, %v1358_v12  ;;  %v1360_v31 = vsub.f32 -inf, %v1358_v12  ;;  %v1361_v32 = vmul.f32 1.442695, %v1359_v30 }
 0xa93   : > { %v1383_v16 = vpop.permute.xlu0 %1382 }
 0xa94   : > { %v1369_v17 = vmul.f32 1.442695, %v1366_v15  ;;  %2050 = vmatpush3.bf16.msra.mxu1 %v1383_v16  ;;  %2278 = vpow2.f32 %v1367_v13  ;;  %v1363_v33 = vmul.f32 1.442695, %v1360_v31 }
 0xa95   : > { %2061 = vmatprep.subr.bf16.mxu1 %v2653_v0  ;;  %v1488_v23 = vpop.permute.xlu1 %1487 }
 0xa96   : > { %2280 = vpow2.f32 %v1369_v17  ;;  %v1493_v26 = vsel %vm935_vm4, %v1488_v23, 0  ;;  %v536_v17 = vld [vmem:[#allocation14 + $0xc] sm:$0xf] }
 0xa97   : > { %2282 = vpow2.f32 %v1361_v32 }
 0xa98   : > { %2284 = vpow2.f32 %v1363_v33 }
 0xa99   : > { %v1486_v27 = vpop.permute.xlu1 %1485 }
 0xa9e   : > { %v2279_v19 = vpop.eup %2278 }
 0xa9f   : > { %v1373_v20 = vsel %vm985_vm5, %v2279_v19, 0.0 }
 0xaa0   : > { %v2281_v22 = vpop.eup %2280  ;;  %1374 = vadd.xlane.f32.xlu0 %v1373_v20 }
 0xaa1   : > { %v1376_v24 = vsel %vm985_vm5, %v2281_v22, 0.0  ;;  %v1381_v25 = vpack.c.bf16 %v2281_v22, %v2279_v19  ;;  %v2283_v34 = vpop.eup %2282  ;;  %v1625_v19 = vsel %vm1208_vm6, %v536_v17, 0 }
 0xaa2   : > { %1377 = vadd.xlane.f32.xlu1 %v1376_v24  ;;  %v2285_v35 = vpop.eup %2284  ;;  %v1371_v37 = vmul.f32 0.0, %v2283_v34 }
 0xaa3   : > { %2052 = vmatmul.mubr.msk.bf16.vlgmr.msra.gmra.mrb[20].mxu1 %vm985_vm5, %v1381_v25  ;;  %v1372_v40 = vmul.f32 0.0, %v2285_v35 }
 0xaa4   : > { %2062 = vmatpush3.bf16.xpose.msra.mxu1 %v1493_v26  ;;  %2063 = vmatprep.mubr.msk.bf16.mxu1 %vm2654_vm0, %v2653_v0 }
 0xaa5   : > { %2073 = vmatprep.subr.bf16.mxu1 %v2653_v0 }
 0xaab   : > { %2064 = vmatmul.mubr.msk.bf16.vlgmr.msra.gmra.mrb[24].mxu1 %vm935_vm4, %v1486_v27 }
 0xaac   : > { %2075 = vmatprep.mubr.msk.bf16.mxu1 %vm2654_vm0, %v2653_v0  ;;  %2074 = vmatpush3.bf16.msra.mxu1 %v1625_v19 }
 0xab3   : > { %1567 = vrot.lane.b32.xlu1 %v3077_v14, %s2666_s25 }
 0xb2d   : > { %v1375_v36 = vpop.xlane.xlu0 %1374 }
 0xb2e   : > { %v1379_v39 = vadd.f32 %v1375_v36, %v1371_v37 }
 0xb2f   : > { %v1378_v38 = vpop.xlane.xlu1 %1377 }
 0xb30   : > { %v1380_v14 = vadd.f32 %v1378_v38, %v1372_v40  ;;  %2286 = vrcp.f32 %v1379_v39 }
 0xb32   : > { %2288 = vrcp.f32 %v1380_v14 }
 0xb33   : > { %v1568_v53 = vpop.permute.xlu1 %1567 }
 0xb3a   : > { %v2287_v44 = vpop.eup %2286 }
 0xb3c   : > { %v2289_v49 = vpop.eup %2288 }
 0xb76   : > { %v1422_v41 = vpop.f32.mrb[20].mxu1 }
 0xb77   : > { %v1429_v42 = vadd.f32 %v1422_v41, %v1371_v37  ;;  %v2053_v43 = vpop.f32.mrb[21].mxu1 }
 0xb78   : > { %v1425_v45 = vpop.f32.mrb[22].mxu1 }
 0xb79   : > { %v1433_v46 = vmul.f32 %v2287_v44, %v1429_v42  ;;  %v1430_v47 = vadd.f32 %v1425_v45, %v1372_v40  ;;  %v2054_v48 = vpop.f32.mrb[23].mxu1  ;;  %v1892_v44 = vld [vmem:[#allocation16] ss:$0 sm:$0xff] }
 0xb7b   : > { %v1434_v50 = vmul.f32 %v2289_v49, %v1430_v47 }
 0xb7d   : > { %v1435_v51 = vpack.c.bf16 %v1434_v50, %v1433_v46 }
 0xb7e   : > { %v1529_v52 = vpop.f32.mrb[24].mxu1 }
 0xb7f   : > { %v1536_v54 = vmul.f32 0.35355338, %v1529_v52  ;;  %2058 = vmatmul.mubr.msk.bf16.vlgmr.msra.gmra.mrb[24].mxu0 %vm935_vm4, %v1435_v51  ;;  %v2065_v55 = vpop.f32.mrb[25].mxu1 }
 0xb80   : > { %2068 = vmatpush3.bf16.msra.mxu0 %v1568_v53  ;;  %v1532_v56 = vpop.f32.mrb[26].mxu1  ;;  %2069 = vmatprep.mubr.msk.bf16.mxu0 %vm2654_vm0, %v2653_v0 }
 0xb81   : > { %v1537_v57 = vmul.f32 0.35355338, %v1532_v56  ;;  %v2066_v58 = vpop.f32.mrb[27].mxu1  ;;  %v1538_v59 = vsel %vm985_vm5, %v1536_v54, -inf }
 0xb82   : > { %1539 = vmax.xlane.f32.xlu0 %v1538_v59 }
 0xb83   : > { %v1541_v61 = vsel %vm985_vm5, %v1537_v57, -inf }
 0xb86   : > { %1542 = vmax.xlane.f32.xlu0 %v1541_v61 }
 0xc0f   : > { %v1540_v62 = vpop.xlane.xlu0 %1539 }
 0xc10   : > { %v1550_v1 = vsub.f32 %v1536_v54, %v1540_v62  ;;  %v1544_v20 = vsub.f32 -inf, %v1540_v62 }
 0xc12   : > { %v1552_v2 = vmul.f32 1.442695, %v1550_v1  ;;  %v1546_v23 = vmul.f32 1.442695, %v1544_v20 }
 0xc13   : > { %v1543_v3 = vpop.xlane.xlu0 %1542 }
 0xc14   : > { %v1551_v4 = vsub.f32 %v1537_v57, %v1543_v3  ;;  %2290 = vpow2.f32 %v1552_v2  ;;  %v1545_v22 = vsub.f32 -inf, %v1543_v3 }
 0xc16   : > { %v1554_v5 = vmul.f32 1.442695, %v1551_v4  ;;  %v1548_v24 = vmul.f32 1.442695, %v1545_v22 }
 0xc18   : > { %2292 = vpow2.f32 %v1554_v5 }
 0xc19   : > { %2294 = vpow2.f32 %v1546_v23 }
 0xc1a   : > { %2296 = vpow2.f32 %v1548_v24 }
 0xc1e   : > { %v2291_v6 = vpop.eup %2290 }
 0xc1f   : > { %v1558_v7 = vsel %vm985_vm5, %v2291_v6, 0.0 }
 0xc20   : > { %1559 = vadd.xlane.f32.xlu0 %v1558_v7 }
 0xc22   : > { %v2293_v0 = vpop.eup %2292 }
 0xc23   : > { %v1561_v8 = vsel %vm985_vm5, %v2293_v0, 0.0  ;;  %v1566_v9 = vpack.c.bf16 %v2293_v0, %v2291_v6  ;;  %v2295_v26 = vpop.eup %2294 }
 0xc24   : > { %1562 = vadd.xlane.f32.xlu0 %v1561_v8  ;;  %v2297_v27 = vpop.eup %2296  ;;  %v1556_v28 = vmul.f32 0.0, %v2295_v26 }
 0xc25   : > { %2070 = vmatmul.mubr.msk.bf16.vlgmr.msra.gmra.mrb[28].mxu0 %vm985_vm5, %v1566_v9  ;;  %v1557_v30 = vmul.f32 0.0, %v2297_v27 }
 0xc52   : > { %v1476_v10 = vpop.f32.mrb[24].mxu0 }
 0xc53   : > { %v1483_v11 = vadd.f32 %v1476_v10, %v3128_v60  ;;  %v2059_v12 = vpop.f32.mrb[25].mxu0 }
 0xc54   : > { %v1479_v13 = vpop.f32.mrb[26].mxu0 }
 0xc55   : > { %v1484_v15 = vadd.f32 %v1479_v13, %v3130_v63  ;;  %v2060_v16 = vpop.f32.mrb[27].mxu0 }
 0xcad   : > { %v1560_v25 = vpop.xlane.xlu0 %1559 }
 0xcae   : > { %v1564_v29 = vadd.f32 %v1560_v25, %v1556_v28 }
 0xcb0   : > { %2298 = vrcp.f32 %v1564_v29 }
 0xcb1   : > { %v1563_v60 = vpop.xlane.xlu0 %1562 }
 0xcb2   : > { %v1565_v31 = vadd.f32 %v1563_v60, %v1557_v30 }
 0xcb4   : > { %2300 = vrcp.f32 %v1565_v31 }
 0xcba   : > { %v2299_v34 = vpop.eup %2298 }
 0xcbe   : > { %v2301_v39 = vpop.eup %2300 }
 0xcf8   : > { %v1607_v63 = vpop.f32.mrb[28].mxu0 }
 0xcf9   : > { %v1614_v32 = vadd.f32 %v1607_v63, %v1556_v28  ;;  %v2071_v33 = vpop.f32.mrb[29].mxu0 }
 0xcfa   : > { %v1610_v35 = vpop.f32.mrb[30].mxu0 }
 0xcfb   : > { %v1618_v36 = vmul.f32 %v2299_v34, %v1614_v32  ;;  %v1615_v37 = vadd.f32 %v1610_v35, %v1557_v30  ;;  %v2072_v38 = vpop.f32.mrb[31].mxu0 }
 0xcfd   : > { %v1619_v40 = vmul.f32 %v2301_v39, %v1615_v37 }
 0xcff   : > { %v1620_v14 = vpack.c.bf16 %v1619_v40, %v1618_v36 }
 0xd01   : > { %2076 = vmatmul.mubr.msk.bf16.vlgmr.msra.gmra.mrb[28].mxu1 %vm935_vm4, %v1620_v14 }
 0xdd4   : > { %v1661_v41 = vpop.f32.mrb[28].mxu1 }
 0xdd5   : > { %v1668_v42 = vadd.f32 %v1661_v41, %v1483_v11  ;;  %v2077_v43 = vpop.f32.mrb[29].mxu1 }
 0xdd6   : > { %v1664_v45 = vpop.f32.mrb[30].mxu1 }
 0xdd7   : > { %v1670_v46 = vadd.f32 %v1668_v42, %v3046_v18  ;;  %v1669_v47 = vadd.f32 %v1664_v45, %v1484_v15  ;;  %v2078_v48 = vpop.f32.mrb[31].mxu1 }
 0xdd9   : > { %v1678_v49 = vadd.f32 %v1892_v44, %v1670_v46  ;;  %v1671_v50 = vadd.f32 %v1669_v47, %v3048_v21 }
 0xddb   : > { %1680 = vst.msk [vmem:[%s458_s29] sm:$0xff] %vm538_vm3, %v1678_v49  ;;  %v1679_v18 = vadd.f32 %v1892_v44, %v1671_v50 }
 0xddd   : > { %1681 = vst.msk [vmem:[%s458_s29 + $0x8] sm:$0xff] %vm538_vm3, %v1679_v18 }
 0xdde   : > { %2569 = shalt.err (!%p2566_p0)
}
 0xddf   : > { %s2570_s23 = scalar_lea.hbm %s3171_s21, 256  ;;  %s2574_s28 = scalar_lea.hbm %s3262_s26, 512 }
 0xde0   : > { %p2571_p2 = scmp.ne.s32.totalorder %s3171_s21, %s2570_s23  ;;  %p2575_p11 = scmp.lt.u32.totalorder %s3171_s21, %s3262_s26 }
 0xde1   : > { %p2576_p6 = scmp.lt.u32.totalorder %s2574_s28, %s2570_s23  ;;  %p2578_p5 = scmp.lt.u32.totalorder %s2570_s23, %s3171_s21 }
 0xde2   : > { %p2572_p9 = pnand %p2571_p2, %p3263_p7 }
 0xde3   : > { %p2577_p12 = por %p2576_p6, %p2575_p11 }
 0xde4   : > { %p2573_p10 = pneg %p2572_p9 }
 0xde5   : > { %p2579_p4 = por %p2578_p5, %p2577_p12 }
 0xde7   : > { %p2580_p1 = pnand %p2579_p4, %p2573_p10 }
 0xde9   : > { %2583 = shalt.err (!%p2580_p1)
}
 0xdea   : > { %s2668_s20 = smov 128   ;;  %s2669_s1 = smov 8  }
 0xdeb   : > { %2137 = dma.vmem_to_hbm [thread:$0]  (%p3263_p7), %s3173_s16, 256, %s3171_s21, %s1683_s15, %s2668_s20, %s2668_s20, %s2669_s1  }
 0xdec PF: > { %s1711_s27 = sand.u32 1, %s2626_s30   ;;  %p3264_p3 = scmp.ne.s32.totalorder %s3251_s13, 0 }
 0xded   : > { %p3265_p8 = scmp.ge.s32.totalorder %s2638_s12, 2  ;;  %s1712_s22 = scalar_lea.sflag [#allocation4], %s1711_s27 }
 0xdef   : > { %p2169_p13 = pnand %p3265_p8, %p3264_p3 }
 0xdf1   : > { %2621 = dma.done.wait (!%p2169_p13), %s1712_s22, 256  }
 0xdf2   : > { %2623 = vsyncadd (!%p2169_p13), %s1712_s22, 4294967040  ;;  %p26_p0 = scmp.ge.s32.totalorder %s2931_s19, 4   ;;  %s3266_s30 = smov %s2630_s10 }
 0xdf3   : > { %s3267_s10 = smov %s2634_s11  ;;  %s3268_s11 = smov %s2942_s18 }
 0xdf4   : > { %s3269_s12 = smov %s2931_s19  ;;  %28 = sbr.rel (!%p26_p0) target bundleno = 13 (0xd), region = 133 }
 0xdfb   :  { %1717 = vsyncpa [#allocation3], 1 }
 0xdfc   :  { %1719 = vsyncpa [#allocation3 + $0x1], 1 }
 0xdfd   :  { %1720 = vsyncpa [#allocation6], 1 }
 0xdfe   :  { %1721 = vsyncpa [#allocation9], 1 }
 0xdff   :  { %1722 = vsyncpa [#allocation12], 1 }
 0xe00   :  { %1723 = vsyncpa [#allocation15], 1 }
 0xe01   :  { %1724 = vsyncpa [#allocation4], 1 }
 0xe02   :  { %1726 = vsyncpa [#allocation4 + $0x1], 1 }

</bundles_post_ra>
